<compile_context>
chip_gen: v7x
topology: tpu7x:2x2x1
jax: 0.10.0
libtpu: 0.0.40
codegen_flags: <defaults>
</compile_context>

<pallas_src>
import functools

import jax
import jax.numpy as jnp
import numpy as np
from jax.experimental import pallas as pl
from jax.experimental.pallas import tpu as pltpu


def _round_up(n, m):
    return ((n + m - 1) // m) * m


def _num_tensorcores_per_chip():
    """2 for dual-TensorCore chips (v7x), else 1.  Heuristic with a safe fallback."""
    try:
        kind = jax.devices()[0].device_kind.lower()
    except Exception:
        return 1
    return 2 if ("v7" in kind or "7x" in kind) else 1


# ------------------------------- fused kernel --------------------------------
def _mada_kernel(x_ref, wf_ref, bf_ref,
                 wcd1_ref, bcd1_ref, wcd2_ref, bcd2_ref,
                 w1cat_ref, b1cat_ref, ecat_ref, w2bd_ref, b2cat_ref,
                 out_ref, *, nct, t_total):
    # feature extractor: Linear(nfeat -> 512-padded) + ReLU   (Dropout == identity)
    xv = x_ref[...].astype(jnp.float32)       # DMA'd in source dtype, upcast in VMEM
    feats = jnp.maximum(
        jnp.dot(xv, wf_ref[...], preferred_element_type=jnp.float32) + bf_ref[...], 0.0)

    # merged class+disease classifier L1 (hidden 50+50 padded to 128 lanes)
    hcd = jnp.maximum(
        jnp.dot(feats, wcd1_ref[...], preferred_element_type=jnp.float32) + bcd1_ref[...],
        0.0)
    # block-diagonal L2 -> lane-dense logits slab: class cols [0,nct), disease [nct,T),
    # zeros elsewhere (zero-padded weights & bias)
    logits = (jnp.dot(hcd, wcd2_ref[...], preferred_element_type=jnp.float32)
              + bcd2_ref[...])

    # group-wise softmax directly on the slab via lane masks (no narrow lane slices)
    col = jax.lax.broadcasted_iota(jnp.int32, logits.shape, 1)
    cmask = col < nct
    dmask = jnp.logical_and(col >= nct, col < t_total)
    neg = jnp.float32(-1e30)
    cmax = jnp.max(jnp.where(cmask, logits, neg), axis=1, keepdims=True)
    dmax = jnp.max(jnp.where(dmask, logits, neg), axis=1, keepdims=True)
    e = jnp.exp(jnp.where(cmask, logits - cmax,
                          jnp.where(dmask, logits - dmax, neg)))      # 0 outside groups
    csum = jnp.sum(jnp.where(cmask, e, 0.0), axis=1, keepdims=True)
    dsum = jnp.sum(jnp.where(dmask, e, 0.0), axis=1, keepdims=True)
    # exact divides kept (approx EUP reciprocal would strain the 1e-4 correctness check)
    probs = e * jnp.where(cmask, 1.0 / csum, jnp.where(dmask, 1.0 / dsum, 0.0))

    # domain heads:  (p_j * feats) @ W1_j  ==  p_j * (feats @ W1_j)
    z = jnp.dot(feats, w1cat_ref[...], preferred_element_type=jnp.float32)     # (TB,TKp)
    # ONE prob-broadcast matmul: probs slab (TB,OW) @ e_cat (OW,TKp)
    p_rep = jnp.dot(probs, ecat_ref[...], preferred_element_type=jnp.float32)  # (TB,TKp)
    h = jnp.maximum(p_rep * z + b1cat_ref[...], 0.0)
    # block-diagonal L2 lands domain logits in cols [dom_off, dom_off+T*nplat) of the
    # same lane-dense slab; the column ranges are disjoint so a plain add merges both
    # results into a single unmasked, lane-dense store.
    dom = jnp.dot(h, w2bd_ref[...], preferred_element_type=jnp.float32) + b2cat_ref[...]
    out_ref[...] = logits + dom


# --------------------------- one-time weight packing --------------------------
def prepare_params(p, nct, ndis):
    """Pack PyTorch-layout weights (already transposed to (in, out)) for the kernel."""
    f32 = np.float32
    wf = np.asarray(p["wf"], f32);  bf = np.asarray(p["bf"], f32)
    wc1 = np.asarray(p["wc1"], f32); bc1 = np.asarray(p["bc1"], f32)
    wc2 = np.asarray(p["wc2"], f32); bc2 = np.asarray(p["bc2"], f32)
    wd1 = np.asarray(p["wd1"], f32); bd1 = np.asarray(p["bd1"], f32)
    wd2 = np.asarray(p["wd2"], f32); bd2 = np.asarray(p["bd2"], f32)
    w1s = np.asarray(p["w1s"], f32); b1s = np.asarray(p["b1s"], f32)
    w2s = np.asarray(p["w2s"], f32); b2s = np.asarray(p["b2s"], f32)

    nfeat, H = wf.shape
    NF = _round_up(nfeat, 128)                  # lane-aligned input feature axis
    Hp = _round_up(H, 128)                      # 500 -> 512 (lane aligned)
    C1, D1 = wc1.shape[1], wd1.shape[1]         # 50, 50
    HC = _round_up(C1 + D1, 128)                # 128
    T = nct + ndis
    K = w1s.shape[2]                            # 25
    nplat = w2s.shape[2]
    TP = T * nplat
    TKp = _round_up(T * K, 128)                 # 175 -> 256 (unmasked VPU/MXU tiles)
    dom_off = _round_up(T, 8)                   # domain block starts at an aligned col
    OW = _round_up(dom_off + TP, 128)           # single lane-dense output slab width

    # head j reuses domain_classifier[widx[j]]   (matches the PyTorch forward loop:
    # class head i -> classifier[i], disease head i -> classifier[i])
    widx = list(range(nct)) + list(range(ndis))

    wf_p = np.zeros((NF, Hp), f32); wf_p[:nfeat, :H] = wf
    bf_p = np.zeros((1, Hp), f32);  bf_p[:, :H] = bf

    wcd1 = np.zeros((Hp, HC), f32)
    wcd1[:H, :C1] = wc1
    wcd1[:H, C1:C1 + D1] = wd1
    bcd1 = np.zeros((1, HC), f32)
    bcd1[:, :C1] = bc1
    bcd1[:, C1:C1 + D1] = bd1

    wcd2 = np.zeros((HC, OW), f32)              # class/disease logits -> lane-dense slab
    wcd2[:C1, :nct] = wc2
    wcd2[C1:C1 + D1, nct:T] = wd2
    bcd2 = np.zeros((1, OW), f32)
    bcd2[:, :nct] = bc2
    bcd2[:, nct:T] = bd2

    w1cat = np.zeros((Hp, TKp), f32)            # concatenated per-head W1 (reuse resolved)
    b1cat = np.zeros((1, TKp), f32)
    ecat = np.zeros((OW, TKp), f32)             # prob-col j -> head-j lane broadcast
    w2bd = np.zeros((TKp, OW), f32)             # block-diagonal per-head W2 -> same slab
    b2cat = np.zeros((1, OW), f32)
    for j, w in enumerate(widx):
        w1cat[:H, j * K:(j + 1) * K] = w1s[w]
        b1cat[:, j * K:(j + 1) * K] = b1s[w]
        ecat[j, j * K:(j + 1) * K] = 1.0
        w2bd[j * K:(j + 1) * K, dom_off + j * nplat:dom_off + (j + 1) * nplat] = w2s[w]
        b2cat[:, dom_off + j * nplat:dom_off + (j + 1) * nplat] = b2s[w]

    dev = jnp.asarray
    return {
        "wf": dev(wf_p), "bf": dev(bf_p),
        "wcd1": dev(wcd1), "bcd1": dev(bcd1), "wcd2": dev(wcd2), "bcd2": dev(bcd2),
        "w1cat": dev(w1cat), "b1cat": dev(b1cat), "ecat": dev(ecat),
        "w2bd": dev(w2bd), "b2cat": dev(b2cat),
        "nct": nct, "ndis": ndis, "nplat": nplat, "T": T, "K": K,
        "TP": TP, "dom_off": dom_off, "OW": OW, "NF": NF, "nfeat": nfeat,
    }


# --------------------------------- forward -----------------------------------
def mada_forward(prep, x, alpha, *, batch_tile=None, max_batch_tile=2048):
    """Fused MADA forward.  Returns (class_logits, disease_logits, domain_logits_packed)
    where domain_logits_packed is (B, T*nplat); head j occupies columns
    [j*nplat, (j+1)*nplat) in the original (class heads then disease heads) order."""
    del alpha  # GRL forward is identity; alpha only scales the backward pass
    nct, T = prep["nct"], prep["T"]
    TP, dom_off, OW, NF = prep["TP"], prep["dom_off"], prep["OW"], prep["NF"]

    if x.dtype not in (jnp.float32, jnp.bfloat16):
        x = x.astype(jnp.float32)          # keep bf16 inputs bf16 (half the DMA bytes)
    B, nfeat = x.shape

    # generation-aware batch tiling:
    #   single-core v5e/v6e -> one whole-batch block (amortize ~0.35us per-step overhead)
    #   dual-core v7x       -> >=2 balanced blocks so the "parallel" axis uses both TCs
    Bp8 = _round_up(B, 8)
    if batch_tile is not None:
        TB = min(_round_up(batch_tile, 8), Bp8)
    else:
        nsteps = max(_num_tensorcores_per_chip(), pl.cdiv(Bp8, max_batch_tile))
        TB = _round_up(pl.cdiv(Bp8, nsteps), 8)
    Bp = _round_up(Bp8, TB)

    if Bp != B or NF != nfeat:
        x = jnp.pad(x, ((0, Bp - B), (0, NF - nfeat)))

    Hp = prep["wf"].shape[1]
    HC = prep["wcd1"].shape[1]
    TKp = prep["w1cat"].shape[1]

    def whole(shape):  # weight blocks: whole array, resident across grid steps
        # note: constant-index blocks are still double-buffered by default; that only
        # matters for very large nfeat (wf is the biggest buffer), so left as-is here.
        return pl.BlockSpec(shape, lambda i: (0, 0))

    out = pl.pallas_call(
        functools.partial(_mada_kernel, nct=nct, t_total=T),
        out_shape=jax.ShapeDtypeStruct((Bp, OW), jnp.float32),
        grid=(Bp // TB,),
        in_specs=[
            pl.BlockSpec((TB, NF), lambda i: (i, 0)),      # x (batch-tiled, lane-aligned)
            whole((NF, Hp)), whole((1, Hp)),               # feature layer
            whole((Hp, HC)), whole((1, HC)),               # merged class/disease L1
            whole((HC, OW)), whole((1, OW)),               # block-diag class/disease L2
            whole((Hp, TKp)), whole((1, TKp)),             # concatenated domain L1
            whole((OW, TKp)),                              # single prob-broadcast matrix
            whole((TKp, OW)), whole((1, OW)),              # block-diag domain L2
        ],
        out_specs=pl.BlockSpec((TB, OW), lambda i: (i, 0)),  # one lane-dense output slab
        compiler_params=pltpu.CompilerParams(
            dimension_semantics=("parallel",),
            vmem_limit_bytes=64 * 1024 * 1024),
    )(x, prep["wf"], prep["bf"],
      prep["wcd1"], prep["bcd1"], prep["wcd2"], prep["bcd2"],
      prep["w1cat"], prep["b1cat"], prep["ecat"],
      prep["w2bd"], prep["b2cat"])

    if Bp != B:
        out = out[:B]
    class_logits = out[:, :nct]
    disease_logits = out[:, nct:T]
    dom_packed = out[:, dom_off:dom_off + TP]
    return class_logits, disease_logits, dom_packed


def split_domain_logits(dom_packed, nplat):
    """Per-head views matching the original module's Python-list output."""
    T = dom_packed.shape[1] // nplat
    return [dom_packed[:, j * nplat:(j + 1) * nplat] for j in range(T)]


# ------------------------------ pure-JAX reference ----------------------------
def mada_reference(p, x, nct, ndis):
    relu = lambda v: jnp.maximum(v, 0.0)
    feats = relu(x @ p["wf"] + p["bf"])
    clog = relu(feats @ p["wc1"] + p["bc1"]) @ p["wc2"] + p["bc2"]
    dlog = relu(feats @ p["wd1"] + p["bd1"]) @ p["wd2"] + p["bd2"]
    cpred = jax.nn.softmax(clog, axis=1)
    dpred = jax.nn.softmax(dlog, axis=1)
    dom = []
    for i in range(nct):
        wrf = cpred[:, i:i + 1] * feats
        dom.append(relu(wrf @ p["w1s"][i] + p["b1s"][i]) @ p["w2s"][i] + p["b2s"][i])
    for i in range(ndis):
        wrf = dpred[:, i:i + 1] * feats
        dom.append(relu(wrf @ p["w1s"][i] + p["b1s"][i]) @ p["w2s"][i] + p["b2s"][i])
    return clog, dlog, dom


# ------------------------------------ main ------------------------------------
if __name__ == "__main__":
    B, nfeatures, nct, ndis, nplat = 8, 32, 4, 3, 5   # disease=True branch
    H = 500                                            # hidden size per module spec
    Tw = nct + ndis                                    # number of domain classifiers

    key = jax.random.PRNGKey(0)
    ks = jax.random.split(key, 16)

    def init(k, shape, scale=0.1):
        return scale * jax.random.normal(k, shape, dtype=jnp.float32)

    # raw PyTorch-style parameters, nn.Linear (out,in) stored transposed as (in,out)
    params = {
        "wf":  init(ks[0], (nfeatures, H)),   "bf":  init(ks[1], (1, H)),
        "wc1": init(ks[2], (H, 50)),          "bc1": init(ks[3], (1, 50)),
        "wc2": init(ks[4], (50, nct)),        "bc2": init(ks[5], (1, nct)),
        "wd1": init(ks[6], (H, 50)),          "bd1": init(ks[7], (1, 50)),
        "wd2": init(ks[8], (50, ndis)),       "bd2": init(ks[9], (1, ndis)),
        "w1s": init(ks[10], (Tw, H, 25)),     "b1s": init(ks[11], (Tw, 1, 25)),
        "w2s": init(ks[12], (Tw, 25, nplat)), "b2s": init(ks[13], (Tw, 1, nplat)),
    }

    x = jax.random.normal(ks[14], (B, nfeatures), dtype=jnp.float32)
    alpha = 0.5

    prep = prepare_params(params, nct, ndis)           # one-time packing/padding
    class_logits, disease_logits, dom_packed = mada_forward(prep, x, alpha)
    jax.block_until_ready(class_logits)
    jax.block_until_ready(disease_logits)
    jax.block_until_ready(dom_packed)

    # correctness check against pure-JAX reference
    r_clog, r_dlog, r_dom = mada_reference(params, x, nct, ndis)
    np.testing.assert_allclose(np.asarray(class_logits), np.asarray(r_clog),
                               rtol=1e-4, atol=1e-4)
    np.testing.assert_allclose(np.asarray(disease_logits), np.asarray(r_dlog),
                               rtol=1e-4, atol=1e-4)
    dom_np = np.asarray(dom_packed)
    assert dom_np.shape == (B, (nct + ndis) * nplat)
    for j, ref in enumerate(r_dom):
        got = dom_np[:, j * nplat:(j + 1) * nplat]
        np.testing.assert_allclose(got, np.asarray(ref), rtol=1e-4, atol=1e-4)

    print("KERNEL_OK")
</pallas_src>

<mosaic_0001>
module attributes {stable_mosaic.version = 11 : i64} {
  func.func @_mada_kernel(%arg0: i32, %arg1: memref<8x128xf32, #tpu.memory_space<vmem>>, %arg2: memref<128x512xf32, #tpu.memory_space<vmem>>, %arg3: memref<1x512xf32, #tpu.memory_space<vmem>>, %arg4: memref<512x128xf32, #tpu.memory_space<vmem>>, %arg5: memref<1x128xf32, #tpu.memory_space<vmem>>, %arg6: memref<128x128xf32, #tpu.memory_space<vmem>>, %arg7: memref<1x128xf32, #tpu.memory_space<vmem>>, %arg8: memref<512x256xf32, #tpu.memory_space<vmem>>, %arg9: memref<1x256xf32, #tpu.memory_space<vmem>>, %arg10: memref<128x256xf32, #tpu.memory_space<vmem>>, %arg11: memref<256x128xf32, #tpu.memory_space<vmem>>, %arg12: memref<1x128xf32, #tpu.memory_space<vmem>>, %arg13: memref<8x128xf32, #tpu.memory_space<vmem>>) attributes {dimension_semantics = [#tpu.dimension_semantics<parallel>], iteration_bounds = array<i64: 1>, scalar_prefetch = 0 : i64, scratch_operands = 0 : i64, tpu.core_type = #tpu.core_type<tc>, window_params = [{transform_indices = @transform_0, window_bounds = array<i64: 8, 128>}, {pipeline_mode = #tpu.pipeline_mode<synchronous>, transform_indices = @transform_1, window_bounds = array<i64: 128, 512>}, {pipeline_mode = #tpu.pipeline_mode<synchronous>, transform_indices = @transform_2, window_bounds = array<i64: 1, 512>}, {pipeline_mode = #tpu.pipeline_mode<synchronous>, transform_indices = @transform_3, window_bounds = array<i64: 512, 128>}, {pipeline_mode = #tpu.pipeline_mode<synchronous>, transform_indices = @transform_4, window_bounds = array<i64: 1, 128>}, {pipeline_mode = #tpu.pipeline_mode<synchronous>, transform_indices = @transform_5, window_bounds = array<i64: 128, 128>}, {pipeline_mode = #tpu.pipeline_mode<synchronous>, transform_indices = @transform_6, window_bounds = array<i64: 1, 128>}, {pipeline_mode = #tpu.pipeline_mode<synchronous>, transform_indices = @transform_7, window_bounds = array<i64: 512, 256>}, {pipeline_mode = #tpu.pipeline_mode<synchronous>, transform_indices = @transform_8, window_bounds = array<i64: 1, 256>}, {pipeline_mode = #tpu.pipeline_mode<synchronous>, transform_indices = @transform_9, window_bounds = array<i64: 128, 256>}, {pipeline_mode = #tpu.pipeline_mode<synchronous>, transform_indices = @transform_10, window_bounds = array<i64: 256, 128>}, {pipeline_mode = #tpu.pipeline_mode<synchronous>, transform_indices = @transform_11, window_bounds = array<i64: 1, 128>}, {transform_indices = @transform_12, window_bounds = array<i64: 8, 128>}]} {
    %c0 = arith.constant 0 : index
    %c0_0 = arith.constant 0 : index
    %0 = vector.load %arg1[%c0, %c0_0] : memref<8x128xf32, #tpu.memory_space<vmem>>, vector<8x128xf32>
    %c0_1 = arith.constant 0 : index
    %c0_2 = arith.constant 0 : index
    %1 = vector.load %arg2[%c0_1, %c0_2] : memref<128x512xf32, #tpu.memory_space<vmem>>, vector<128x512xf32>
    %cst = arith.constant dense<0.000000e+00> : vector<8x512xf32>
    %2 = tpu.matmul %0, %1, %cst {dimension_numbers = #tpu.dot_dimension_numbers<[1], [0], [0], [1], [0, 0, 1, 1], [], []>} : vector<8x128xf32>, vector<128x512xf32>, vector<8x512xf32> -> vector<8x512xf32>
    %c0_3 = arith.constant 0 : index
    %c0_4 = arith.constant 0 : index
    %3 = vector.load %arg3[%c0_3, %c0_4] : memref<1x512xf32, #tpu.memory_space<vmem>>, vector<1x512xf32>
    %4 = vector.broadcast %3 : vector<1x512xf32> to vector<8x512xf32>
    %5 = arith.addf %2, %4 : vector<8x512xf32>
    %cst_5 = arith.constant 0.000000e+00 : f32
    %6 = vector.broadcast %cst_5 : f32 to vector<8x512xf32>
    %7 = arith.maximumf %5, %6 : vector<8x512xf32>
    %c0_6 = arith.constant 0 : index
    %c0_7 = arith.constant 0 : index
    %8 = vector.load %arg4[%c0_6, %c0_7] : memref<512x128xf32, #tpu.memory_space<vmem>>, vector<512x128xf32>
    %cst_8 = arith.constant dense<0.000000e+00> : vector<8x128xf32>
    %9 = tpu.matmul %7, %8, %cst_8 {dimension_numbers = #tpu.dot_dimension_numbers<[1], [0], [0], [1], [0, 0, 1, 1], [], []>} : vector<8x512xf32>, vector<512x128xf32>, vector<8x128xf32> -> vector<8x128xf32>
    %c0_9 = arith.constant 0 : index
    %c0_10 = arith.constant 0 : index
    %10 = vector.load %arg5[%c0_9, %c0_10] : memref<1x128xf32, #tpu.memory_space<vmem>>, vector<1x128xf32>
    %11 = vector.broadcast %10 : vector<1x128xf32> to vector<8x128xf32>
    %12 = arith.addf %9, %11 : vector<8x128xf32>
    %cst_11 = arith.constant 0.000000e+00 : f32
    %13 = vector.broadcast %cst_11 : f32 to vector<8x128xf32>
    %14 = arith.maximumf %12, %13 : vector<8x128xf32>
    %c0_12 = arith.constant 0 : index
    %c0_13 = arith.constant 0 : index
    %15 = vector.load %arg6[%c0_12, %c0_13] : memref<128x128xf32, #tpu.memory_space<vmem>>, vector<128x128xf32>
    %cst_14 = arith.constant dense<0.000000e+00> : vector<8x128xf32>
    %16 = tpu.matmul %14, %15, %cst_14 {dimension_numbers = #tpu.dot_dimension_numbers<[1], [0], [0], [1], [0, 0, 1, 1], [], []>} : vector<8x128xf32>, vector<128x128xf32>, vector<8x128xf32> -> vector<8x128xf32>
    %c0_15 = arith.constant 0 : index
    %c0_16 = arith.constant 0 : index
    %17 = vector.load %arg7[%c0_15, %c0_16] : memref<1x128xf32, #tpu.memory_space<vmem>>, vector<1x128xf32>
    %18 = vector.broadcast %17 : vector<1x128xf32> to vector<8x128xf32>
    %19 = arith.addf %16, %18 : vector<8x128xf32>
    %20 = tpu.iota {dimensions = array<i32: 1>} : vector<8x128xi32>
    %c4_i32 = arith.constant 4 : i32
    %21 = vector.broadcast %c4_i32 : i32 to vector<8x128xi32>
    %22 = arith.cmpi slt, %20, %21 : vector<8x128xi32>
    %c4_i32_17 = arith.constant 4 : i32
    %23 = vector.broadcast %c4_i32_17 : i32 to vector<8x128xi32>
    %24 = arith.cmpi sge, %20, %23 : vector<8x128xi32>
    %c7_i32 = arith.constant 7 : i32
    %25 = vector.broadcast %c7_i32 : i32 to vector<8x128xi32>
    %26 = arith.cmpi slt, %20, %25 : vector<8x128xi32>
    %27 = arith.andi %24, %26 : vector<8x128xi1>
    %cst_18 = arith.constant -1.000000e+30 : f32
    %28 = vector.broadcast %cst_18 : f32 to vector<8x128xf32>
    %29 = arith.select %22, %19, %28 : vector<8x128xi1>, vector<8x128xf32>
    %cst_19 = arith.constant dense<0xFF800000> : vector<8xf32>
    %30 = vector.multi_reduction <maximumf>, %29, %cst_19 [1] : vector<8x128xf32> to vector<8xf32>
    %31 = vector.shape_cast %30 : vector<8xf32> to vector<8x1xf32>
    %cst_20 = arith.constant -1.000000e+30 : f32
    %32 = vector.broadcast %cst_20 : f32 to vector<8x128xf32>
    %33 = arith.select %27, %19, %32 : vector<8x128xi1>, vector<8x128xf32>
    %cst_21 = arith.constant dense<0xFF800000> : vector<8xf32>
    %34 = vector.multi_reduction <maximumf>, %33, %cst_21 [1] : vector<8x128xf32> to vector<8xf32>
    %35 = vector.shape_cast %34 : vector<8xf32> to vector<8x1xf32>
    %36 = vector.broadcast %31 : vector<8x1xf32> to vector<8x128xf32>
    %37 = arith.subf %19, %36 : vector<8x128xf32>
    %38 = vector.broadcast %35 : vector<8x1xf32> to vector<8x128xf32>
    %39 = arith.subf %19, %38 : vector<8x128xf32>
    %cst_22 = arith.constant -1.000000e+30 : f32
    %40 = vector.broadcast %cst_22 : f32 to vector<8x128xf32>
    %41 = arith.select %27, %39, %40 : vector<8x128xi1>, vector<8x128xf32>
    %42 = arith.select %22, %37, %41 : vector<8x128xi1>, vector<8x128xf32>
    %43 = math.exp %42 : vector<8x128xf32>
    %cst_23 = arith.constant 0.000000e+00 : f32
    %44 = vector.broadcast %cst_23 : f32 to vector<8x128xf32>
    %45 = arith.select %22, %43, %44 : vector<8x128xi1>, vector<8x128xf32>
    %cst_24 = arith.constant dense<0.000000e+00> : vector<8xf32>
    %46 = vector.multi_reduction <add>, %45, %cst_24 [1] : vector<8x128xf32> to vector<8xf32>
    %47 = vector.shape_cast %46 : vector<8xf32> to vector<8x1xf32>
    %cst_25 = arith.constant 0.000000e+00 : f32
    %48 = vector.broadcast %cst_25 : f32 to vector<8x128xf32>
    %49 = arith.select %27, %43, %48 : vector<8x128xi1>, vector<8x128xf32>
    %cst_26 = arith.constant dense<0.000000e+00> : vector<8xf32>
    %50 = vector.multi_reduction <add>, %49, %cst_26 [1] : vector<8x128xf32> to vector<8xf32>
    %51 = vector.shape_cast %50 : vector<8xf32> to vector<8x1xf32>
    %cst_27 = arith.constant 1.000000e+00 : f32
    %52 = vector.broadcast %cst_27 : f32 to vector<8x1xf32>
    %53 = arith.divf %52, %47 : vector<8x1xf32>
    %cst_28 = arith.constant 1.000000e+00 : f32
    %54 = vector.broadcast %cst_28 : f32 to vector<8x1xf32>
    %55 = arith.divf %54, %51 : vector<8x1xf32>
    %cst_29 = arith.constant 0.000000e+00 : f32
    %56 = vector.shape_cast %55 : vector<8x1xf32> to vector<8x1xf32>
    %57 = vector.broadcast %56 : vector<8x1xf32> to vector<8x128xf32>
    %58 = vector.broadcast %cst_29 : f32 to vector<8x128xf32>
    %59 = arith.select %27, %57, %58 : vector<8x128xi1>, vector<8x128xf32>
    %60 = vector.shape_cast %53 : vector<8x1xf32> to vector<8x1xf32>
    %61 = vector.broadcast %60 : vector<8x1xf32> to vector<8x128xf32>
    %62 = arith.select %22, %61, %59 : vector<8x128xi1>, vector<8x128xf32>
    %63 = arith.mulf %43, %62 : vector<8x128xf32>
    %c0_30 = arith.constant 0 : index
    %c0_31 = arith.constant 0 : index
    %64 = vector.load %arg8[%c0_30, %c0_31] : memref<512x256xf32, #tpu.memory_space<vmem>>, vector<512x256xf32>
    %cst_32 = arith.constant dense<0.000000e+00> : vector<8x256xf32>
    %65 = tpu.matmul %7, %64, %cst_32 {dimension_numbers = #tpu.dot_dimension_numbers<[1], [0], [0], [1], [0, 0, 1, 1], [], []>} : vector<8x512xf32>, vector<512x256xf32>, vector<8x256xf32> -> vector<8x256xf32>
    %c0_33 = arith.constant 0 : index
    %c0_34 = arith.constant 0 : index
    %66 = vector.load %arg10[%c0_33, %c0_34] : memref<128x256xf32, #tpu.memory_space<vmem>>, vector<128x256xf32>
    %cst_35 = arith.constant dense<0.000000e+00> : vector<8x256xf32>
    %67 = tpu.matmul %63, %66, %cst_35 {dimension_numbers = #tpu.dot_dimension_numbers<[1], [0], [0], [1], [0, 0, 1, 1], [], []>} : vector<8x128xf32>, vector<128x256xf32>, vector<8x256xf32> -> vector<8x256xf32>
    %68 = arith.mulf %67, %65 : vector<8x256xf32>
    %c0_36 = arith.constant 0 : index
    %c0_37 = arith.constant 0 : index
    %69 = vector.load %arg9[%c0_36, %c0_37] : memref<1x256xf32, #tpu.memory_space<vmem>>, vector<1x256xf32>
    %70 = vector.broadcast %69 : vector<1x256xf32> to vector<8x256xf32>
    %71 = arith.addf %68, %70 : vector<8x256xf32>
    %cst_38 = arith.constant 0.000000e+00 : f32
    %72 = vector.broadcast %cst_38 : f32 to vector<8x256xf32>
    %73 = arith.maximumf %71, %72 : vector<8x256xf32>
    %c0_39 = arith.constant 0 : index
    %c0_40 = arith.constant 0 : index
    %74 = vector.load %arg11[%c0_39, %c0_40] : memref<256x128xf32, #tpu.memory_space<vmem>>, vector<256x128xf32>
    %cst_41 = arith.constant dense<0.000000e+00> : vector<8x128xf32>
    %75 = tpu.matmul %73, %74, %cst_41 {dimension_numbers = #tpu.dot_dimension_numbers<[1], [0], [0], [1], [0, 0, 1, 1], [], []>} : vector<8x256xf32>, vector<256x128xf32>, vector<8x128xf32> -> vector<8x128xf32>
    %c0_42 = arith.constant 0 : index
    %c0_43 = arith.constant 0 : index
    %76 = vector.load %arg12[%c0_42, %c0_43] : memref<1x128xf32, #tpu.memory_space<vmem>>, vector<1x128xf32>
    %77 = vector.broadcast %76 : vector<1x128xf32> to vector<8x128xf32>
    %78 = arith.addf %75, %77 : vector<8x128xf32>
    %79 = arith.addf %19, %78 : vector<8x128xf32>
    %c0_44 = arith.constant 0 : index
    %c0_45 = arith.constant 0 : index
    %80 = vector.load %arg13[%c0_44, %c0_45] : memref<8x128xf32, #tpu.memory_space<vmem>>, vector<8x128xf32>
    tpu.vector_store %arg13[%c0_44, %c0_45], %79 {strides = array<i32>} : memref<8x128xf32, #tpu.memory_space<vmem>>, vector<8x128xf32>,
    return
  }
  func.func @transform_0(%arg0: i32) -> (i32, i32) {
    %c0_i32 = arith.constant 0 : i32
    %c0_i32_0 = arith.constant 0 : i32
    return %arg0, %c0_i32 : i32, i32
  }
  func.func @transform_1(%arg0: i32) -> (i32, i32) {
    %c0_i32 = arith.constant 0 : i32
    %c0_i32_0 = arith.constant 0 : i32
    %c0_i32_1 = arith.constant 0 : i32
    return %c0_i32, %c0_i32_0 : i32, i32
  }
  func.func @transform_2(%arg0: i32) -> (i32, i32) {
    %c0_i32 = arith.constant 0 : i32
    %c0_i32_0 = arith.constant 0 : i32
    %c0_i32_1 = arith.constant 0 : i32
    return %c0_i32, %c0_i32_0 : i32, i32
  }
  func.func @transform_3(%arg0: i32) -> (i32, i32) {
    %c0_i32 = arith.constant 0 : i32
    %c0_i32_0 = arith.constant 0 : i32
    %c0_i32_1 = arith.constant 0 : i32
    return %c0_i32, %c0_i32_0 : i32, i32
  }
  func.func @transform_4(%arg0: i32) -> (i32, i32) {
    %c0_i32 = arith.constant 0 : i32
    %c0_i32_0 = arith.constant 0 : i32
    %c0_i32_1 = arith.constant 0 : i32
    return %c0_i32, %c0_i32_0 : i32, i32
  }
  func.func @transform_5(%arg0: i32) -> (i32, i32) {
    %c0_i32 = arith.constant 0 : i32
    %c0_i32_0 = arith.constant 0 : i32
    %c0_i32_1 = arith.constant 0 : i32
    return %c0_i32, %c0_i32_0 : i32, i32
  }
  func.func @transform_6(%arg0: i32) -> (i32, i32) {
    %c0_i32 = arith.constant 0 : i32
    %c0_i32_0 = arith.constant 0 : i32
    %c0_i32_1 = arith.constant 0 : i32
    return %c0_i32, %c0_i32_0 : i32, i32
  }
  func.func @transform_7(%arg0: i32) -> (i32, i32) {
    %c0_i32 = arith.constant 0 : i32
    %c0_i32_0 = arith.constant 0 : i32
    %c0_i32_1 = arith.constant 0 : i32
    return %c0_i32, %c0_i32_0 : i32, i32
  }
  func.func @transform_8(%arg0: i32) -> (i32, i32) {
    %c0_i32 = arith.constant 0 : i32
    %c0_i32_0 = arith.constant 0 : i32
    %c0_i32_1 = arith.constant 0 : i32
    return %c0_i32, %c0_i32_0 : i32, i32
  }
  func.func @transform_9(%arg0: i32) -> (i32, i32) {
    %c0_i32 = arith.constant 0 : i32
    %c0_i32_0 = arith.constant 0 : i32
    %c0_i32_1 = arith.constant 0 : i32
    return %c0_i32, %c0_i32_0 : i32, i32
  }
  func.func @transform_10(%arg0: i32) -> (i32, i32) {
    %c0_i32 = arith.constant 0 : i32
    %c0_i32_0 = arith.constant 0 : i32
    %c0_i32_1 = arith.constant 0 : i32
    return %c0_i32, %c0_i32_0 : i32, i32
  }
  func.func @transform_11(%arg0: i32) -> (i32, i32) {
    %c0_i32 = arith.constant 0 : i32
    %c0_i32_0 = arith.constant 0 : i32
    %c0_i32_1 = arith.constant 0 : i32
    return %c0_i32, %c0_i32_0 : i32, i32
  }
  func.func @transform_12(%arg0: i32) -> (i32, i32) {
    %c0_i32 = arith.constant 0 : i32
    %c0_i32_0 = arith.constant 0 : i32
    return %arg0, %c0_i32 : i32, i32
  }
}

</mosaic_0001>

<bundles_post_ra>
// kernel: tpu_custom_call.1
= control target key start
LH: loop header
LB: loop body
LE: loop exit
PB: predicated region body
PF: predicated region fallthrough
CT: control target
= control target key end

     0   :  { %17 = vsyncpa [#allocation3], 0  ;;  %s2467_s0 = inlined_call_operand.hbm [shape: f32[8,128], index: 0, kind: input, shape index: {}]   ;;  %s2468_s1 = inlined_call_operand.hbm [shape: f32[128,512], index: 1, kind: input, shape index: {}]   ;;  %s2469_s2 = inlined_call_operand.hbm [shape: f32[1,512], index: 2, kind: input, shape index: {}]   ;;  %s2470_s3 = inlined_call_operand.hbm [shape: f32[512,128], index: 3, kind: input, shape index: {}]   ;;  %s2471_s4 = inlined_call_operand.hbm [shape: f32[1,128], index: 4, kind: input, shape index: {}]   ;;  %s2472_s5 = inlined_call_operand.hbm [shape: f32[128,128], index: 5, kind: input, shape index: {}]   ;;  %s2473_s6 = inlined_call_operand.hbm [shape: f32[1,128], index: 6, kind: input, shape index: {}]   ;;  %s2474_s7 = inlined_call_operand.hbm [shape: f32[512,256], index: 7, kind: input, shape index: {}]   ;;  %s2475_s8 = inlined_call_operand.hbm [shape: f32[1,256], index: 8, kind: input, shape index: {}]   ;;  %s2476_s9 = inlined_call_operand.hbm [shape: f32[128,256], index: 9, kind: input, shape index: {}]   ;;  %s2477_s10 = inlined_call_operand.hbm [shape: f32[256,128], index: 10, kind: input, shape index: {}]   ;;  %s2478_s11 = inlined_call_operand.hbm [shape: f32[1,128], index: 11, kind: input, shape index: {}]   ;;  %s2479_s12 = inlined_call_operand.hbm [shape: f32[8,128], index: 12, kind: output, shape index: {}]  }
   0x1   :  { %18 = vsyncpa [#allocation6], 0 }
   0x2   :  { %19 = vsyncpa [#allocation9], 0 }
   0x3   :  { %20 = vsyncpa [#allocation12], 0 }
   0x4   :  { %21 = vsyncpa [#allocation15], 0 }
   0x5   :  { %22 = vsyncpa [#allocation18], 0 }
   0x6   :  { %23 = vsyncpa [#allocation21], 0 }
   0x7   :  { %24 = vsyncpa [#allocation4], 0  ;;  %s2121_s21 = smov [#allocation5]   ;;  %s1819_s25 = scalar_lea.hbm %s2468_s1, 8192 }
   0x8   :  { %s40_s22 = sshll.u32 %s2121_s21, 4  ;;  %p1820_p0 = scmp.ne.s32.totalorder %s2468_s1, %s1819_s25  ;;  %s41_s22 = int_to_ptr.vmem [resolvable:$true] %s40_s22 }
   0x9   :  { %p1823_p1 = scmp.lt.u32.totalorder %s1819_s25, %s2468_s1 }
   0xb   :  { %p1825_p2 = pnand %p1823_p1, %p1820_p0 }
   0xd   :  { %1828 = shalt.err (!%p1825_p2)
}
   0xe   :  { %s1829_s30 = scalar_lea.vmem %s41_s22, 8192  ;;  %p1834_p4 = scmp.lt.s32.totalorder %s41_s22, %s41_s22 }
   0xf   :  { %p1830_p3 = scmp.ne.s32.totalorder %s41_s22, %s1829_s30  ;;  %p1835_p5 = scmp.lt.s32.totalorder %s1829_s30, %s1829_s30 }
  0x11   :  { %p1836_p6 = por %p1835_p5, %p1834_p4 }
  0x13   :  { %p1837_p7 = pnand %p1836_p6, %p1830_p3 }
  0x15   :  { %1840 = shalt.err (!%p1837_p7)
}
  0x16   :  { %s2122_s13 = smov 512   ;;  %s2123_s14 = smov 32  }
  0x17   :  { %46 = dma.hbm_to_vmem [thread:$0]  %s2468_s1, 8192, %s41_s22, [#allocation6], %s2122_s13, %s2122_s13, %s2123_s14  }
  0x18   :  { %s2124_s17 = smov [#allocation8]   ;;  %s1841_s21 = scalar_lea.hbm %s2470_s3, 8192 }
  0x19   :  { %s62_s18 = sshll.u32 %s2124_s17, 4  ;;  %p1842_p8 = scmp.ne.s32.totalorder %s2470_s3, %s1841_s21  ;;  %s63_s18 = int_to_ptr.vmem [resolvable:$true] %s62_s18 }
  0x1a   :  { %p1845_p9 = scmp.lt.u32.totalorder %s1841_s21, %s2470_s3 }
  0x1c   :  { %p1847_p10 = pnand %p1845_p9, %p1842_p8 }
  0x1e   :  { %1850 = shalt.err (!%p1847_p10)
}
  0x1f   :  { %s1851_s27 = scalar_lea.vmem %s63_s18, 8192  ;;  %p1856_p12 = scmp.lt.s32.totalorder %s63_s18, %s63_s18 }
  0x20   :  { %p1852_p11 = scmp.ne.s32.totalorder %s63_s18, %s1851_s27  ;;  %p1857_p13 = scmp.lt.s32.totalorder %s1851_s27, %s1851_s27 }
  0x22   :  { %p1858_p0 = por %p1857_p13, %p1856_p12 }
  0x24   :  { %p1859_p1 = pnand %p1858_p0, %p1852_p11 }
  0x26   :  { %1862 = shalt.err (!%p1859_p1)
}
  0x27   :  { %s2125_s1 = smov 128   ;;  %s2126_s22 = smov 8  }
  0x28   :  { %68 = dma.hbm_to_vmem [thread:$0]  %s2470_s3, 8192, %s63_s18, [#allocation9], %s2125_s1, %s2125_s1, %s2126_s22  }
  0x29   :  { %s2127_s30 = smov [#allocation11]   ;;  %s2128_s14 = smov [#allocation14]  }
  0x2a   :  { %s84_s13 = sshll.u32 %s2127_s30, 4  ;;  %s106_s15 = sshll.u32 %s2128_s14, 4  ;;  %s85_s13 = int_to_ptr.vmem [resolvable:$true] %s84_s13  ;;  %s2235_s15 = int_to_ptr.vmem [resolvable:$true] %s106_s15 }
  0x2b   :  { %s1863_s19 = scalar_lea.hbm %s2472_s5, 2048 }
  0x2c   :  { %p1864_p2 = scmp.ne.s32.totalorder %s2472_s5, %s1863_s19  ;;  %p1867_p3 = scmp.lt.u32.totalorder %s1863_s19, %s2472_s5 }
  0x2e   :  { %p1869_p4 = pnand %p1867_p3, %p1864_p2 }
  0x30   :  { %1872 = shalt.err (!%p1869_p4)
}
  0x31   :  { %s1873_s3 = scalar_lea.vmem %s85_s13, 2048  ;;  %p1878_p6 = scmp.lt.s32.totalorder %s85_s13, %s85_s13 }
  0x32   :  { %p1874_p5 = scmp.ne.s32.totalorder %s85_s13, %s1873_s3  ;;  %p1879_p7 = scmp.lt.s32.totalorder %s1873_s3, %s1873_s3 }
  0x34   :  { %p1880_p8 = por %p1879_p7, %p1878_p6 }
  0x36   :  { %p1881_p9 = pnand %p1880_p8, %p1874_p5 }
  0x38   :  { %1884 = shalt.err (!%p1881_p9)
}
  0x39   :  { %90 = dma.hbm_to_vmem [thread:$0]  %s2472_s5, 2048, %s85_s13, [#allocation12], %s2125_s1, %s2125_s1, %s2126_s22  }
  0x3a   :  { %s1885_s28 = scalar_lea.hbm %s2474_s7, 16384 }
  0x3b   :  { %p1886_p10 = scmp.ne.s32.totalorder %s2474_s7, %s1885_s28  ;;  %p1889_p11 = scmp.lt.u32.totalorder %s1885_s28, %s2474_s7 }
  0x3d   :  { %p1891_p12 = pnand %p1889_p11, %p1886_p10 }
  0x3f   :  { %1894 = shalt.err (!%p1891_p12)
}
  0x40   :  { %s1895_s17 = scalar_lea.vmem %s2235_s15, 16384  ;;  %p1900_p0 = scmp.lt.s32.totalorder %s2235_s15, %s2235_s15 }
  0x41   :  { %p1896_p13 = scmp.ne.s32.totalorder %s2235_s15, %s1895_s17  ;;  %p1901_p1 = scmp.lt.s32.totalorder %s1895_s17, %s1895_s17 }
  0x43   :  { %p1902_p2 = por %p1901_p1, %p1900_p0 }
  0x45   :  { %p1903_p3 = pnand %p1902_p2, %p1896_p13 }
  0x47   :  { %1906 = shalt.err (!%p1903_p3)
}
  0x48   :  { %s2129_s5 = smov 256   ;;  %s2130_s13 = smov 16  }
  0x49   :  { %112 = dma.hbm_to_vmem [thread:$0]  %s2474_s7, 16384, %s2235_s15, [#allocation15], %s2129_s5, %s2129_s5, %s2130_s13  }
  0x4a   :  { %s2131_s21 = smov [#allocation17]   ;;  %s2132_s24 = smov [#allocation2]  }
  0x4b   :  { %s128_s23 = sshll.u32 %s2131_s21, 4  ;;  %s31_s3 = sshll.u32 %s2132_s24, 4  ;;  %s129_s23 = int_to_ptr.vmem [resolvable:$true] %s128_s23  ;;  %s32_s3 = int_to_ptr.vmem [resolvable:$true] %s31_s3 }
  0x4c   :  { %s1907_s26 = scalar_lea.hbm %s2476_s9, 4096 }
  0x4d   :  { %p1908_p4 = scmp.ne.s32.totalorder %s2476_s9, %s1907_s26  ;;  %p1911_p5 = scmp.lt.u32.totalorder %s1907_s26, %s2476_s9 }
  0x4f   :  { %p1913_p6 = pnand %p1911_p5, %p1908_p4 }
  0x51   :  { %1916 = shalt.err (!%p1913_p6)
}
  0x52   :  { %s1917_s7 = scalar_lea.vmem %s129_s23, 4096  ;;  %p1922_p8 = scmp.lt.s32.totalorder %s129_s23, %s129_s23 }
  0x53   :  { %p1918_p7 = scmp.ne.s32.totalorder %s129_s23, %s1917_s7  ;;  %p1923_p9 = scmp.lt.s32.totalorder %s1917_s7, %s1917_s7 }
  0x55   :  { %p1924_p10 = por %p1923_p9, %p1922_p8 }
  0x57   :  { %p1925_p11 = pnand %p1924_p10, %p1918_p7 }
  0x59   :  { %1928 = shalt.err (!%p1925_p11)
}
  0x5a   :  { %134 = dma.hbm_to_vmem [thread:$0]  %s2476_s9, 4096, %s129_s23, [#allocation18], %s2129_s5, %s2129_s5, %s2130_s13  }
  0x5b   :  { %s1929_s19 = scalar_lea.hbm %s2467_s0, 128 }
  0x5c   :  { %p1930_p12 = scmp.ne.s32.totalorder %s2467_s0, %s1929_s19  ;;  %p1933_p13 = scmp.lt.u32.totalorder %s1929_s19, %s2467_s0 }
  0x5e   :  { %p1935_p0 = pnand %p1933_p13, %p1930_p12 }
  0x60   :  { %1938 = shalt.err (!%p1935_p0)
}
  0x61   :  { %s1939_s25 = scalar_lea.vmem %s32_s3, 128  ;;  %p1944_p2 = scmp.lt.s32.totalorder %s32_s3, %s32_s3 }
  0x62   :  { %p1940_p1 = scmp.ne.s32.totalorder %s32_s3, %s1939_s25  ;;  %p1945_p3 = scmp.lt.s32.totalorder %s1939_s25, %s1939_s25 }
  0x64   :  { %p1946_p4 = por %p1945_p3, %p1944_p2 }
  0x66   :  { %p1947_p5 = pnand %p1946_p4, %p1940_p1 }
  0x68   :  { %1950 = shalt.err (!%p1947_p5)
}
  0x69   :  { %34 = dma.hbm_to_vmem [thread:$0]  %s2467_s0, 128, %s32_s3, [#allocation3]  }
  0x6a   :  { %s2133_s13 = smov [#allocation7]   ;;  %s2134_s26 = smov [#allocation10]  }
  0x6b   :  { %s53_s23 = sshll.u32 %s2133_s13, 4  ;;  %s75_s27 = sshll.u32 %s2134_s26, 4  ;;  %s54_s23 = int_to_ptr.vmem [resolvable:$true] %s53_s23  ;;  %s76_s27 = int_to_ptr.vmem [resolvable:$true] %s75_s27 }
  0x6c   :  { %s1951_s30 = scalar_lea.hbm %s2469_s2, 64 }
  0x6d   :  { %p1952_p6 = scmp.ne.s32.totalorder %s2469_s2, %s1951_s30  ;;  %p1955_p7 = scmp.lt.u32.totalorder %s1951_s30, %s2469_s2 }
  0x6f   :  { %p1957_p8 = pnand %p1955_p7, %p1952_p6 }
  0x71   :  { %1960 = shalt.err (!%p1957_p8)
}
  0x72   :  { %s1961_s0 = scalar_lea.vmem %s54_s23, 64  ;;  %p1966_p10 = scmp.lt.s32.totalorder %s54_s23, %s54_s23 }
  0x73   :  { %p1962_p9 = scmp.ne.s32.totalorder %s54_s23, %s1961_s0  ;;  %p1967_p11 = scmp.lt.s32.totalorder %s1961_s0, %s1961_s0 }
  0x75   :  { %p1968_p12 = por %p1967_p11, %p1966_p10 }
  0x77   :  { %p1969_p13 = pnand %p1968_p12, %p1962_p9 }
  0x79   :  { %1972 = shalt.err (!%p1969_p13)
}
  0x7a   :  { %56 = dma.hbm_to_vmem [thread:$0]  %s2469_s2, 64, %s54_s23, [#allocation6]  }
  0x7b   :  { %s1973_s21 = scalar_lea.hbm %s2471_s4, 16 }
  0x7c   :  { %p1974_p0 = scmp.ne.s32.totalorder %s2471_s4, %s1973_s21  ;;  %p1977_p1 = scmp.lt.u32.totalorder %s1973_s21, %s2471_s4 }
  0x7e   :  { %p1979_p2 = pnand %p1977_p1, %p1974_p0 }
  0x80   :  { %1982 = shalt.err (!%p1979_p2)
}
  0x81   :  { %s1983_s5 = scalar_lea.vmem %s76_s27, 16  ;;  %s1987_s13 = scalar_lea.vmem %s76_s27, 32 }
  0x82   :  { %p1984_p3 = scmp.ne.s32.totalorder %s76_s27, %s1983_s5  ;;  %p1988_p4 = scmp.lt.s32.totalorder %s76_s27, %s76_s27 }
  0x83   :  { %p1989_p5 = scmp.lt.s32.totalorder %s1987_s13, %s1983_s5 }
  0x85   :  { %p1990_p6 = por %p1989_p5, %p1988_p4 }
  0x87   :  { %p1991_p7 = pnand %p1990_p6, %p1984_p3 }
  0x89   :  { %1994 = shalt.err (!%p1991_p7)
}
  0x8a   :  { %78 = dma.hbm_to_vmem [thread:$0]  %s2471_s4, 16, %s76_s27, [#allocation9]  }
  0x8b   :  { %s2135_s26 = smov [#allocation13]   ;;  %s2136_s29 = smov [#allocation16]  }
  0x8c   :  { %s97_s28 = sshll.u32 %s2135_s26, 4  ;;  %s119_s30 = sshll.u32 %s2136_s29, 4  ;;  %s98_s28 = int_to_ptr.vmem [resolvable:$true] %s97_s28  ;;  %s120_s30 = int_to_ptr.vmem [resolvable:$true] %s119_s30 }
  0x8d   :  { %s1995_s14 = scalar_lea.hbm %s2473_s6, 16 }
  0x8e   :  { %p1996_p8 = scmp.ne.s32.totalorder %s2473_s6, %s1995_s14  ;;  %p1999_p9 = scmp.lt.u32.totalorder %s1995_s14, %s2473_s6 }
  0x90   :  { %p2001_p10 = pnand %p1999_p9, %p1996_p8 }
  0x92   :  { %2004 = shalt.err (!%p2001_p10)
}
  0x93   :  { %s2005_s4 = scalar_lea.vmem %s98_s28, 16  ;;  %s2009_s27 = scalar_lea.vmem %s98_s28, 32 }
  0x94   :  { %p2006_p11 = scmp.ne.s32.totalorder %s98_s28, %s2005_s4  ;;  %p2010_p12 = scmp.lt.s32.totalorder %s98_s28, %s98_s28 }
  0x95   :  { %p2011_p13 = scmp.lt.s32.totalorder %s2009_s27, %s2005_s4 }
  0x97   :  { %p2012_p0 = por %p2011_p13, %p2010_p12 }
  0x99   :  { %p2013_p1 = pnand %p2012_p0, %p2006_p11 }
  0x9b   :  { %2016 = shalt.err (!%p2013_p1)
}
  0x9c   :  { %100 = dma.hbm_to_vmem [thread:$0]  %s2473_s6, 16, %s98_s28, [#allocation12]  }
  0x9d   :  { %s2017_s18 = scalar_lea.hbm %s2475_s8, 32 }
  0x9e   :  { %p2018_p2 = scmp.ne.s32.totalorder %s2475_s8, %s2017_s18  ;;  %p2021_p3 = scmp.lt.u32.totalorder %s2017_s18, %s2475_s8 }
  0xa0   :  { %p2023_p4 = pnand %p2021_p3, %p2018_p2 }
  0xa2   :  { %2026 = shalt.err (!%p2023_p4)
}
  0xa3   :  { %s2027_s2 = scalar_lea.vmem %s120_s30, 32  ;;  %p2032_p6 = scmp.lt.s32.totalorder %s120_s30, %s120_s30 }
  0xa4   :  { %p2028_p5 = scmp.ne.s32.totalorder %s120_s30, %s2027_s2  ;;  %p2033_p7 = scmp.lt.s32.totalorder %s2027_s2, %s2027_s2 }
  0xa6   :  { %p2034_p8 = por %p2033_p7, %p2032_p6 }
  0xa8   :  { %p2035_p9 = pnand %p2034_p8, %p2028_p5 }
  0xaa   :  { %2038 = shalt.err (!%p2035_p9)
}
  0xab   :  { %122 = dma.hbm_to_vmem [thread:$0]  %s2475_s8, 32, %s120_s30, [#allocation15]  }
  0xac   :  { %s2137_s26 = smov [#allocation19]   ;;  %s2138_s29 = smov [#allocation20]  }
  0xad   :  { %s140_s28 = sshll.u32 %s2137_s26, 4  ;;  %s153_s7 = sshll.u32 %s2138_s29, 4  ;;  %s141_s28 = int_to_ptr.vmem [resolvable:$true] %s140_s28  ;;  %s154_s7 = int_to_ptr.vmem [resolvable:$true] %s153_s7 }
  0xae   :  { %s2039_s16 = scalar_lea.hbm %s2477_s10, 4096 }
  0xaf   :  { %p2040_p10 = scmp.ne.s32.totalorder %s2477_s10, %s2039_s16  ;;  %p2043_p11 = scmp.lt.u32.totalorder %s2039_s16, %s2477_s10 }
  0xb1   :  { %p2045_p12 = pnand %p2043_p11, %p2040_p10 }
  0xb3   :  { %2048 = shalt.err (!%p2045_p12)
}
  0xb4   :  { %s2049_s8 = scalar_lea.vmem %s141_s28, 4096  ;;  %p2054_p0 = scmp.lt.s32.totalorder %s141_s28, %s141_s28 }
  0xb5   :  { %p2050_p13 = scmp.ne.s32.totalorder %s141_s28, %s2049_s8  ;;  %p2055_p1 = scmp.lt.s32.totalorder %s2049_s8, %s2049_s8 }
  0xb7   :  { %p2056_p2 = por %p2055_p1, %p2054_p0 }
  0xb9   :  { %p2057_p3 = pnand %p2056_p2, %p2050_p13 }
  0xbb   :  { %2060 = shalt.err (!%p2057_p3)
}
  0xbc   :  { %146 = dma.hbm_to_vmem [thread:$0]  %s2477_s10, 4096, %s141_s28, [#allocation18], %s2125_s1, %s2125_s1, %s2126_s22  }
  0xbd   :  { %s2061_s21 = scalar_lea.hbm %s2478_s11, 16 }
  0xbe   :  { %p2062_p4 = scmp.ne.s32.totalorder %s2478_s11, %s2061_s21  ;;  %p2065_p5 = scmp.lt.u32.totalorder %s2061_s21, %s2478_s11 }
  0xc0   :  { %p2067_p6 = pnand %p2065_p5, %p2062_p4 }
  0xc2   :  { %2070 = shalt.err (!%p2067_p6)
}
  0xc3   :  { %s2071_s5 = scalar_lea.vmem %s154_s7, 16  ;;  %s2075_s13 = scalar_lea.vmem %s154_s7, 32 }
  0xc4   :  { %p2072_p7 = scmp.ne.s32.totalorder %s154_s7, %s2071_s5  ;;  %p2076_p8 = scmp.lt.s32.totalorder %s154_s7, %s154_s7 }
  0xc5   :  { %p2077_p9 = scmp.lt.s32.totalorder %s2075_s13, %s2071_s5 }
  0xc7   :  { %p2078_p10 = por %p2077_p9, %p2076_p8 }
  0xc9   :  { %p2079_p11 = pnand %p2078_p10, %p2072_p7 }
  0xcb   :  { %2082 = shalt.err (!%p2079_p11)
}
  0xcc   :  { %156 = dma.hbm_to_vmem [thread:$0]  %s2478_s11, 16, %s154_s7, [#allocation21]  }
  0xcd   :  { %2105 = dma.done.wait [#allocation3], 128  }
  0xce   :  { %2106 = vsyncadd [#allocation3], 4294967168 }
  0xcf   :  { %2107 = dma.done.wait [#allocation6], 8256  }
  0xd0   :  { %2108 = vsyncadd [#allocation6], 4294959040 }
  0xd1   :  { %2109 = dma.done.wait [#allocation9], 8208  }
  0xd2   :  { %2110 = vsyncadd [#allocation9], 4294959088 }
  0xd3   :  { %2111 = dma.done.wait [#allocation12], 2064  }
  0xd4   :  { %2112 = vsyncadd [#allocation12], 4294965232 }
  0xd5   :  { %2113 = dma.done.wait [#allocation15], 16416  }
  0xd6   :  { %2114 = vsyncadd [#allocation15], 4294950880 }
  0xd7   :  { %2115 = dma.done.wait [#allocation18], 8192  }
  0xd8   :  { %2116 = vsyncadd [#allocation18], 4294959104 }
  0xd9   :  { %2117 = dma.done.wait [#allocation21], 16  }
  0xda   :  { %2118 = vsyncadd [#allocation21], 4294967280  ;;  %v2139_v0 = vmov 0.0   ;;  %v195_v1 = vld [vmem:[#allocation5 + $0x8] sm:$0xff]  ;;  %v197_v3 = vld [vmem:[#allocation5 + $0x18] sm:$0xff]  ;;  %vm2141_vm0 = vmmov 0  }
  0xdb   :  { %344 = vmatprep.mubr.f32.mxu0 %v2139_v0  ;;  %415 = vmatprep.mubr.f32.mxu1 %v2139_v0  ;;  %v199_v2 = vld [vmem:[#allocation5 + $0x28] sm:$0xff]  ;;  %v201_v5 = vld [vmem:[#allocation5 + $0x38] sm:$0xff]  ;;  %v194_v6 = vld [vmem:[#allocation5] sm:$0xff]  ;;  %s2142_s11 = smov [#allocation22]  }
  0xdc   :  { %v1445_v4 = vpack.c.bf16 %v199_v2, %v195_v1  ;;  %v198_v7 = vld [vmem:[#allocation5 + $0x20] sm:$0xff]  ;;  %v1477_v8 = vpack.c.bf16 %v201_v5, %v197_v3  ;;  %v196_v10 = vld [vmem:[#allocation5 + $0x10] sm:$0xff]  ;;  %v203_v12 = vld [vmem:[#allocation5 + $0x48] sm:$0xff]  ;;  %s1270_s22 = sshll.u32 %s2142_s11, 4  ;;  %s1271_s22 = int_to_ptr.vmem [resolvable:$true] %s1270_s22 }
  0xdd   :  { %v1447_v9 = vpack.c.bf16 %v198_v7, %v194_v6  ;;  %v200_v11 = vld [vmem:[#allocation5 + $0x30] sm:$0xff]  ;;  %v207_v14 = vld [vmem:[#allocation5 + $0x68] sm:$0xff]  ;;  %v205_v15 = vld [vmem:[#allocation5 + $0x58] sm:$0xff]  ;;  %s2083_s2 = scalar_lea.vmem %s1271_s22, 128  ;;  %p2088_p13 = scmp.lt.s32.totalorder %s1271_s22, %s1271_s22 }
  0xde   :  { %1446 = vmatprep.subr.bf16.mxu0 %v1445_v4  ;;  %v1479_v13 = vpack.c.bf16 %v200_v11, %v196_v10  ;;  %v209_v16 = vld [vmem:[#allocation5 + $0x78] sm:$0xff]  ;;  %1478 = vmatprep.subr.bf16.mxu1 %v1477_v8  ;;  %v1449_v17 = vpack.c.bf16 %v207_v14, %v203_v12  ;;  %v202_v19 = vld [vmem:[#allocation5 + $0x40] sm:$0xff]  ;;  %v204_v21 = vld [vmem:[#allocation5 + $0x50] sm:$0xff]  ;;  %p2084_p12 = scmp.ne.s32.totalorder %s1271_s22, %s2083_s2  ;;  %p2089_p0 = scmp.lt.s32.totalorder %s2083_s2, %s2083_s2 }
  0xdf   :  { %1448 = vmatpush1.bf16.msra.mxu0 %v1447_v9  ;;  %v1481_v18 = vpack.c.bf16 %v209_v16, %v205_v15  ;;  %v206_v20 = vld [vmem:[#allocation5 + $0x60] sm:$0xff]  ;;  %v208_v23 = vld [vmem:[#allocation5 + $0x70] sm:$0xff]  ;;  %v211_v24 = vld [vmem:[#allocation5 + $0x88] sm:$0xff] }
  0xe0   :  { %1480 = vmatpush1.bf16.msra.mxu1 %v1479_v13  ;;  %v1451_v22 = vpack.c.bf16 %v206_v20, %v202_v19  ;;  %v215_v25 = vld [vmem:[#allocation5 + $0xa8] sm:$0xff]  ;;  %1450 = vmatprep.subr.bf16.mxu0 %v1449_v17  ;;  %v1483_v26 = vpack.c.bf16 %v208_v23, %v204_v21  ;;  %v213_v28 = vld [vmem:[#allocation5 + $0x98] sm:$0xff]  ;;  %v210_v30 = vld [vmem:[#allocation5 + $0x80] sm:$0xff]  ;;  %p2090_p1 = por %p2089_p0, %p2088_p13 }
  0xe1   :  { %1482 = vmatprep.subr.bf16.mxu1 %v1481_v18  ;;  %v1453_v27 = vpack.c.bf16 %v215_v25, %v211_v24  ;;  %v217_v29 = vld [vmem:[#allocation5 + $0xb8] sm:$0xff]  ;;  %v214_v32 = vld [vmem:[#allocation5 + $0xa0] sm:$0xff]  ;;  %v212_v33 = vld [vmem:[#allocation5 + $0x90] sm:$0xff] }
  0xe2   :  { %v1485_v31 = vpack.c.bf16 %v217_v29, %v213_v28  ;;  %v216_v34 = vld [vmem:[#allocation5 + $0xb0] sm:$0xff]  ;;  %v1455_v35 = vpack.c.bf16 %v214_v32, %v210_v30  ;;  %v219_v36 = vld [vmem:[#allocation5 + $0xc8] sm:$0xff]  ;;  %v221_v38 = vld [vmem:[#allocation5 + $0xd8] sm:$0xff]  ;;  %p2091_p2 = pnand %p2090_p1, %p2084_p12 }
  0xe3   :  { %1452 = vmatpush1.bf16.msra.mxu0 %v1451_v22  ;;  %v223_v37 = vld [vmem:[#allocation5 + $0xe8] sm:$0xff]  ;;  %v1487_v39 = vpack.c.bf16 %v216_v34, %v212_v33  ;;  %v225_v41 = vld [vmem:[#allocation5 + $0xf8] sm:$0xff]  ;;  %v218_v42 = vld [vmem:[#allocation5 + $0xc0] sm:$0xff] }
  0xe4   :  { %1484 = vmatpush1.bf16.msra.mxu1 %v1483_v26  ;;  %1454 = vmatprep.subr.bf16.mxu0 %v1453_v27  ;;  %v1457_v40 = vpack.c.bf16 %v223_v37, %v219_v36  ;;  %v222_v43 = vld [vmem:[#allocation5 + $0xe0] sm:$0xff]  ;;  %v1489_v44 = vpack.c.bf16 %v225_v41, %v221_v38  ;;  %v220_v45 = vld [vmem:[#allocation5 + $0xd0] sm:$0xff]  ;;  %v227_v47 = vld [vmem:[#allocation5 + $0x108] sm:$0xff] }
  0xe5   :  { %1486 = vmatprep.subr.bf16.mxu1 %v1485_v31  ;;  %v224_v46 = vld [vmem:[#allocation5 + $0xf0] sm:$0xff]  ;;  %v231_v48 = vld [vmem:[#allocation5 + $0x128] sm:$0xff]  ;;  %v229_v49 = vld [vmem:[#allocation5 + $0x118] sm:$0xff]  ;;  %v1459_v51 = vpack.c.bf16 %v222_v43, %v218_v42 }
  0xe6   :  { %v233_v50 = vld [vmem:[#allocation5 + $0x138] sm:$0xff]  ;;  %v1491_v52 = vpack.c.bf16 %v224_v46, %v220_v45  ;;  %v1461_v53 = vpack.c.bf16 %v231_v48, %v227_v47  ;;  %v226_v54 = vld [vmem:[#allocation5 + $0x100] sm:$0xff]  ;;  %v228_v56 = vld [vmem:[#allocation5 + $0x110] sm:$0xff] }
  0xe7   :  { %1456 = vmatpush1.bf16.msra.mxu0 %v1455_v35  ;;  %v230_v55 = vld [vmem:[#allocation5 + $0x120] sm:$0xff]  ;;  %v1493_v57 = vpack.c.bf16 %v233_v50, %v229_v49  ;;  %v232_v58 = vld [vmem:[#allocation5 + $0x130] sm:$0xff]  ;;  %v235_v59 = vld [vmem:[#allocation5 + $0x148] sm:$0xff] }
  0xe8   :  { %1488 = vmatpush1.bf16.msra.mxu1 %v1487_v39  ;;  %1458 = vmatprep.subr.bf16.mxu0 %v1457_v40  ;;  %v239_v60 = vld [vmem:[#allocation5 + $0x168] sm:$0xff]  ;;  %v237_v61 = vld [vmem:[#allocation5 + $0x158] sm:$0xff]  ;;  %v1463_v63 = vpack.c.bf16 %v230_v55, %v226_v54  ;;  %v1495_v1 = vpack.c.bf16 %v232_v58, %v228_v56  ;;  %v234_v3 = vld [vmem:[#allocation5 + $0x140] sm:$0xff] }
  0xe9   :  { %1490 = vmatprep.subr.bf16.mxu1 %v1489_v44  ;;  %v241_v62 = vld [vmem:[#allocation5 + $0x178] sm:$0xff]  ;;  %v1465_v2 = vpack.c.bf16 %v239_v60, %v235_v59  ;;  %v238_v4 = vld [vmem:[#allocation5 + $0x160] sm:$0xff]  ;;  %v236_v5 = vld [vmem:[#allocation5 + $0x150] sm:$0xff] }
  0xea   :  { %v1497_v6 = vpack.c.bf16 %v241_v62, %v237_v61  ;;  %v240_v7 = vld [vmem:[#allocation5 + $0x170] sm:$0xff]  ;;  %v243_v8 = vld [vmem:[#allocation5 + $0x188] sm:$0xff]  ;;  %v245_v10 = vld [vmem:[#allocation5 + $0x198] sm:$0xff]  ;;  %v1467_v12 = vpack.c.bf16 %v238_v4, %v234_v3 }
  0xeb   :  { %1460 = vmatpush1.bf16.msra.mxu0 %v1459_v51  ;;  %v247_v9 = vld [vmem:[#allocation5 + $0x1a8] sm:$0xff]  ;;  %v249_v11 = vld [vmem:[#allocation5 + $0x1b8] sm:$0xff]  ;;  %v1499_v13 = vpack.c.bf16 %v240_v7, %v236_v5  ;;  %v242_v15 = vld [vmem:[#allocation5 + $0x180] sm:$0xff] }
  0xec   :  { %1492 = vmatpush1.bf16.msra.mxu1 %v1491_v52  ;;  %1462 = vmatprep.subr.bf16.mxu0 %v1461_v53  ;;  %v1469_v14 = vpack.c.bf16 %v247_v9, %v243_v8  ;;  %v246_v16 = vld [vmem:[#allocation5 + $0x1a0] sm:$0xff]  ;;  %v244_v17 = vld [vmem:[#allocation5 + $0x190] sm:$0xff]  ;;  %v1501_v18 = vpack.c.bf16 %v249_v11, %v245_v10  ;;  %v251_v20 = vld [vmem:[#allocation5 + $0x1c8] sm:$0xff] }
  0xed   :  { %1494 = vmatprep.subr.bf16.mxu1 %v1493_v57  ;;  %v248_v19 = vld [vmem:[#allocation5 + $0x1b0] sm:$0xff]  ;;  %v255_v21 = vld [vmem:[#allocation5 + $0x1e8] sm:$0xff]  ;;  %v253_v22 = vld [vmem:[#allocation5 + $0x1d8] sm:$0xff]  ;;  %v1471_v24 = vpack.c.bf16 %v246_v16, %v242_v15 }
  0xee   :  { %v257_v23 = vld [vmem:[#allocation5 + $0x1f8] sm:$0xff]  ;;  %v1503_v25 = vpack.c.bf16 %v248_v19, %v244_v17  ;;  %v1473_v26 = vpack.c.bf16 %v255_v21, %v251_v20  ;;  %v250_v27 = vld [vmem:[#allocation5 + $0x1c0] sm:$0xff]  ;;  %v252_v29 = vld [vmem:[#allocation5 + $0x1d0] sm:$0xff] }
  0xef   :  { %1464 = vmatpush1.bf16.msra.mxu0 %v1463_v63  ;;  %v254_v28 = vld [vmem:[#allocation5 + $0x1e0] sm:$0xff]  ;;  %v1505_v30 = vpack.c.bf16 %v257_v23, %v253_v22  ;;  %v256_v31 = vld [vmem:[#allocation5 + $0x1f0] sm:$0xff]  ;;  %v193_v48 = vld [vmem:[#allocation2] sm:$0xff] }
  0xf0   :  { %1496 = vmatpush1.bf16.msra.mxu1 %v1495_v1  ;;  %1466 = vmatprep.subr.bf16.mxu0 %v1465_v2  ;;  %v442_v32 = vld [vmem:[#allocation8 + $0x80] sm:$0xff]  ;;  %v443_v33 = vld [vmem:[#allocation8 + $0x88] sm:$0xff]  ;;  %v1475_v36 = vpack.c.bf16 %v254_v28, %v250_v27  ;;  %v1507_v37 = vpack.c.bf16 %v256_v31, %v252_v29  ;;  %v444_v44 = vld [vmem:[#allocation8 + $0x90] sm:$0xff] }
  0xf1   :  { %1498 = vmatprep.subr.bf16.mxu1 %v1497_v6  ;;  %v474_v34 = vld [vmem:[#allocation8 + $0x180] sm:$0xff]  ;;  %v475_v35 = vld [vmem:[#allocation8 + $0x188] sm:$0xff]  ;;  %v1509_v38 = vpack.c.bf16 %v443_v33, %v442_v32  ;;  %v445_v45 = vld [vmem:[#allocation8 + $0x98] sm:$0xff] }
  0xf2   :  { %v458_v39 = vld [vmem:[#allocation8 + $0x100] sm:$0xff]  ;;  %v427_v41 = vld [vmem:[#allocation8 + $0x8] sm:$0xff]  ;;  %v1541_v42 = vpack.c.bf16 %v475_v35, %v474_v34  ;;  %v476_v46 = vld [vmem:[#allocation8 + $0x190] sm:$0xff]  ;;  %v1513_v51 = vpack.c.bf16 %v445_v45, %v444_v44 }
  0xf3   :  { %1468 = vmatpush1.bf16.msra.mxu0 %v1467_v12  ;;  %v426_v40 = vld [vmem:[#allocation8] sm:$0xff]  ;;  %v459_v43 = vld [vmem:[#allocation8 + $0x108] sm:$0xff]  ;;  %v477_v47 = vld [vmem:[#allocation8 + $0x198] sm:$0xff] }
  0xf4   :  { %1500 = vmatpush1.bf16.msra.mxu1 %v1499_v13  ;;  %1470 = vmatprep.subr.bf16.mxu0 %v1469_v14  ;;  %v1511_v49 = vpack.c.bf16 %v427_v41, %v426_v40  ;;  %v1543_v50 = vpack.c.bf16 %v459_v43, %v458_v39  ;;  %v460_v52 = vld [vmem:[#allocation8 + $0x110] sm:$0xff]  ;;  %v429_v54 = vld [vmem:[#allocation8 + $0x18] sm:$0xff]  ;;  %v1545_v55 = vpack.c.bf16 %v477_v47, %v476_v46  ;;  %v446_v57 = vld [vmem:[#allocation8 + $0xa0] sm:$0xff] }
  0xf5   :  { %1502 = vmatprep.subr.bf16.mxu1 %v1501_v18  ;;  %v428_v53 = vld [vmem:[#allocation8 + $0x10] sm:$0xff]  ;;  %v461_v56 = vld [vmem:[#allocation8 + $0x118] sm:$0xff]  ;;  %v447_v58 = vld [vmem:[#allocation8 + $0xa8] sm:$0xff] }
  0xf6   :  { %v478_v59 = vld [vmem:[#allocation8 + $0x1a0] sm:$0xff]  ;;  %v479_v60 = vld [vmem:[#allocation8 + $0x1a8] sm:$0xff]  ;;  %v1515_v61 = vpack.c.bf16 %v429_v54, %v428_v53  ;;  %v1547_v62 = vpack.c.bf16 %v461_v56, %v460_v52  ;;  %v1517_v63 = vpack.c.bf16 %v447_v58, %v446_v57  ;;  %v448_v6 = vld [vmem:[#allocation8 + $0xb0] sm:$0xff] }
  0xf7   :  { %1472 = vmatpush1.bf16.msra.mxu0 %v1471_v24  ;;  %v462_v1 = vld [vmem:[#allocation8 + $0x120] sm:$0xff]  ;;  %v431_v3 = vld [vmem:[#allocation8 + $0x28] sm:$0xff]  ;;  %v1549_v4 = vpack.c.bf16 %v479_v60, %v478_v59  ;;  %v449_v7 = vld [vmem:[#allocation8 + $0xb8] sm:$0xff] }
  0xf8   :  { %1504 = vmatpush1.bf16.msra.mxu1 %v1503_v25  ;;  %1474 = vmatprep.subr.bf16.mxu0 %v1473_v26  ;;  %v430_v2 = vld [vmem:[#allocation8 + $0x20] sm:$0xff]  ;;  %v463_v5 = vld [vmem:[#allocation8 + $0x128] sm:$0xff]  ;;  %v480_v8 = vld [vmem:[#allocation8 + $0x1b0] sm:$0xff]  ;;  %v1521_v12 = vpack.c.bf16 %v449_v7, %v448_v6 }
  0xf9   :  { %1506 = vmatprep.subr.bf16.mxu1 %v1505_v30  ;;  %v481_v9 = vld [vmem:[#allocation8 + $0x1b8] sm:$0xff]  ;;  %v1519_v10 = vpack.c.bf16 %v431_v3, %v430_v2  ;;  %v1551_v11 = vpack.c.bf16 %v463_v5, %v462_v1  ;;  %v464_v13 = vld [vmem:[#allocation8 + $0x130] sm:$0xff]  ;;  %v450_v18 = vld [vmem:[#allocation8 + $0xc0] sm:$0xff] }
  0xfa   :  { %v432_v14 = vld [vmem:[#allocation8 + $0x30] sm:$0xff]  ;;  %v433_v15 = vld [vmem:[#allocation8 + $0x38] sm:$0xff]  ;;  %v1553_v16 = vpack.c.bf16 %v481_v9, %v480_v8  ;;  %v451_v19 = vld [vmem:[#allocation8 + $0xc8] sm:$0xff]  ;;  %v260_v8 = vlaneseq }
  0xfb   :  { %1476 = vmatpush1.bf16.msra.mxu0 %v1475_v36  ;;  %v465_v17 = vld [vmem:[#allocation8 + $0x138] sm:$0xff]  ;;  %v482_v20 = vld [vmem:[#allocation8 + $0x1c0] sm:$0xff]  ;;  %v483_v21 = vld [vmem:[#allocation8 + $0x1c8] sm:$0xff]  ;;  %v1523_v22 = vpack.c.bf16 %v433_v15, %v432_v14  ;;  %v1525_v24 = vpack.c.bf16 %v451_v19, %v450_v18 }
  0xfc   :  { %1508 = vmatpush1.bf16.msra.mxu1 %v1507_v37  ;;  %1510 = vmatprep.subr.bf16.mxu0 %v1509_v38  ;;  %v1555_v23 = vpack.c.bf16 %v465_v17, %v464_v13  ;;  %v466_v25 = vld [vmem:[#allocation8 + $0x140] sm:$0xff]  ;;  %v435_v27 = vld [vmem:[#allocation8 + $0x48] sm:$0xff]  ;;  %v1557_v28 = vpack.c.bf16 %v483_v21, %v482_v20  ;;  %v452_v30 = vld [vmem:[#allocation8 + $0xd0] sm:$0xff]  ;;  %v2371_v9 = vshrl.u32 %v260_v8, 7 }
  0xfd   :  { %1542 = vmatprep.subr.bf16.mxu1 %v1541_v42  ;;  %v434_v26 = vld [vmem:[#allocation8 + $0x40] sm:$0xff]  ;;  %v467_v29 = vld [vmem:[#allocation8 + $0x148] sm:$0xff]  ;;  %v453_v31 = vld [vmem:[#allocation8 + $0xd8] sm:$0xff] }
  0xfe   :  { %345 = vmatmul.mubr.f32.vlgmr.msra.gmra.mrb[0].mxu0 %v193_v48  ;;  %v484_v32 = vld [vmem:[#allocation8 + $0x1d0] sm:$0xff]  ;;  %v485_v33 = vld [vmem:[#allocation8 + $0x1d8] sm:$0xff]  ;;  %v1527_v34 = vpack.c.bf16 %v435_v27, %v434_v26  ;;  %v1559_v35 = vpack.c.bf16 %v467_v29, %v466_v25  ;;  %v1529_v36 = vpack.c.bf16 %v453_v31, %v452_v30  ;;  %v454_v42 = vld [vmem:[#allocation8 + $0xe0] sm:$0xff]  ;;  %v266_v13 = vsub.s32 1, %v2371_v9 }
  0xff   :  { %416 = vmatmul.mubr.f32.vlgmr.msra.gmra.mrb[0].mxu1 %v193_v48  ;;  %1512 = vmatpush3.bf16.msra.mxu0 %v1511_v49  ;;  %v468_v37 = vld [vmem:[#allocation8 + $0x150] sm:$0xff]  ;;  %v437_v39 = vld [vmem:[#allocation8 + $0x58] sm:$0xff]  ;;  %v1561_v40 = vpack.c.bf16 %v485_v33, %v484_v32  ;;  %v455_v43 = vld [vmem:[#allocation8 + $0xe8] sm:$0xff]  ;;  %v274_v14 = vsub.s32 3, %v2371_v9 }
 0x100   :  { %1544 = vmatpush3.bf16.msra.mxu1 %v1543_v50  ;;  %1514 = vmatprep.subr.bf16.mxu0 %v1513_v51  ;;  %v436_v38 = vld [vmem:[#allocation8 + $0x50] sm:$0xff]  ;;  %v469_v41 = vld [vmem:[#allocation8 + $0x158] sm:$0xff]  ;;  %v486_v44 = vld [vmem:[#allocation8 + $0x1e0] sm:$0xff]  ;;  %v1533_v48 = vpack.c.bf16 %v455_v43, %v454_v42 }
 0x101   :  { %1546 = vmatprep.subr.bf16.mxu1 %v1545_v55  ;;  %v487_v45 = vld [vmem:[#allocation8 + $0x1e8] sm:$0xff]  ;;  %v1531_v46 = vpack.c.bf16 %v437_v39, %v436_v38  ;;  %v1563_v47 = vpack.c.bf16 %v469_v41, %v468_v37  ;;  %v470_v50 = vld [vmem:[#allocation8 + $0x160] sm:$0xff]  ;;  %v488_v56 = vld [vmem:[#allocation8 + $0x1f0] sm:$0xff] }
 0x102   :  { %v1565_v49 = vpack.c.bf16 %v487_v45, %v486_v44  ;;  %v471_v51 = vld [vmem:[#allocation8 + $0x168] sm:$0xff]  ;;  %v438_v53 = vld [vmem:[#allocation8 + $0x60] sm:$0xff]  ;;  %v489_v57 = vld [vmem:[#allocation8 + $0x1f8] sm:$0xff] }
 0x103   :  { %1516 = vmatpush3.bf16.msra.mxu0 %v1515_v61  ;;  %v1567_v52 = vpack.c.bf16 %v471_v51, %v470_v50  ;;  %v439_v54 = vld [vmem:[#allocation8 + $0x68] sm:$0xff]  ;;  %v1569_v58 = vpack.c.bf16 %v489_v57, %v488_v56  ;;  %v456_v59 = vld [vmem:[#allocation8 + $0xf0] sm:$0xff]  ;;  %v457_v60 = vld [vmem:[#allocation8 + $0xf8] sm:$0xff]  ;;  %v2140_v50 = vmov 0.0|0.0  }
 0x104   :  { %1548 = vmatpush3.bf16.msra.mxu1 %v1547_v62  ;;  %1518 = vmatprep.subr.bf16.mxu0 %v1517_v63  ;;  %v1535_v55 = vpack.c.bf16 %v439_v54, %v438_v53  ;;  %v472_v61 = vld [vmem:[#allocation8 + $0x170] sm:$0xff]  ;;  %v1537_v62 = vpack.c.bf16 %v457_v60, %v456_v59  ;;  %v473_v63 = vld [vmem:[#allocation8 + $0x178] sm:$0xff]  ;;  %v762_v26 = vld [vmem:[#allocation14] sm:$0xff] }
 0x105   :  { %1550 = vmatprep.subr.bf16.mxu1 %v1549_v4  ;;  %v440_v1 = vld [vmem:[#allocation8 + $0x70] sm:$0xff]  ;;  %v441_v2 = vld [vmem:[#allocation8 + $0x78] sm:$0xff]  ;;  %v1571_v3 = vpack.c.bf16 %v473_v63, %v472_v61  ;;  %v766_v37 = vld [vmem:[#allocation14 + $0x20] sm:$0xff] }
 0x106   :  { %v1539_v4 = vpack.c.bf16 %v441_v2, %v440_v1  ;;  %v763_v5 = vld [vmem:[#allocation14 + $0x8] sm:$0xff]  ;;  %v765_v6 = vld [vmem:[#allocation14 + $0x18] sm:$0xff]  ;;  %v764_v27 = vld [vmem:[#allocation14 + $0x10] sm:$0xff] }
 0x107   :  { %1520 = vmatpush3.bf16.msra.mxu0 %v1519_v10  ;;  %v1597_v7 = vpack.c.bf16 %v765_v6, %v763_v5  ;;  %v262_v10 = vsub.s32 0, %v2371_v9  ;;  %v767_v29 = vld [vmem:[#allocation14 + $0x28] sm:$0xff]  ;;  %v769_v30 = vld [vmem:[#allocation14 + $0x38] sm:$0xff]  ;;  %v768_v38 = vld [vmem:[#allocation14 + $0x30] sm:$0xff] }
 0x108   :  { %1552 = vmatpush3.bf16.msra.mxu1 %v1551_v11  ;;  %1522 = vmatprep.subr.bf16.mxu0 %v1521_v12  ;;  %v258_v11 = vld [vmem:[#allocation7] sm:$0xf]  ;;  %v270_v12 = vsub.s32 2, %v2371_v9  ;;  %v771_v39 = vld [vmem:[#allocation14 + $0x48] sm:$0xff]  ;;  %v638_v41 = vld [vmem:[#allocation11] sm:$0xff]  ;;  %v1603_v44 = vpack.c.bf16 %v768_v38, %v766_v37 }
 0x109   :  { %1554 = vmatprep.subr.bf16.mxu1 %v1553_v16  ;;  %v263_v15 = vrot.slane %v258_v11, %v262_v10  ;;  %v267_v17 = vrot.slane %v258_v11, %v266_v13  ;;  %v275_v18 = vrot.slane %v258_v11, %v274_v14  ;;  %v639_v42 = vld [vmem:[#allocation11 + $0x8] sm:$0xff]  ;;  %v640_v43 = vld [vmem:[#allocation11 + $0x10] sm:$0xff]  ;;  %v642_v54 = vld [vmem:[#allocation11 + $0x20] sm:$0xff] }
 0x10a   :  { %v271_v16 = vrot.slane %v258_v11, %v270_v12  ;;  %v1574_v45 = vpack.c.bf16 %v639_v42, %v638_v41  ;;  %v775_v51 = vld [vmem:[#allocation14 + $0x68] sm:$0xff]  ;;  %v776_v59 = vld [vmem:[#allocation14 + $0x70] sm:$0xff]  ;;  %v781_v61 = vld [vmem:[#allocation14 + $0x98] sm:$0xff] }
 0x10b   :  { %1524 = vmatpush3.bf16.msra.mxu0 %v1523_v22  ;;  %v779_v60 = vld [vmem:[#allocation14 + $0x88] sm:$0xff]  ;;  %v645_v1 = vld [vmem:[#allocation11 + $0x38] sm:$0xff]  ;;  %v646_v12 = vld [vmem:[#allocation11 + $0x40] sm:$0xff] }
 0x10c   :  { %1556 = vmatpush3.bf16.msra.mxu1 %v1555_v23  ;;  %1526 = vmatprep.subr.bf16.mxu0 %v1525_v24  ;;  %v644_v63 = vld [vmem:[#allocation11 + $0x30] sm:$0xff]  ;;  %v647_v14 = vld [vmem:[#allocation11 + $0x48] sm:$0xff]  ;;  %v797_v42 = vld [vmem:[#allocation14 + $0x118] sm:$0xff] }
 0x10d   :  { %1558 = vmatprep.subr.bf16.mxu1 %v1557_v28  ;;  %v780_v5 = vld [vmem:[#allocation14 + $0x90] sm:$0xff]  ;;  %v783_v6 = vld [vmem:[#allocation14 + $0xa8] sm:$0xff]  ;;  %v1583_v11 = vpack.c.bf16 %v645_v1, %v644_v63  ;;  %v806_v1 = vld [vmem:[#allocation14 + $0x160] sm:$0xff] }
 0x10e   :  { %v795_v41 = vld [vmem:[#allocation14 + $0x108] sm:$0xff] }
 0x10f   :  { %1528 = vmatpush3.bf16.msra.mxu0 %v1527_v34 }
 0x110   :  { %1560 = vmatpush3.bf16.msra.mxu1 %v1559_v35  ;;  %1530 = vmatprep.subr.bf16.mxu0 %v1529_v36  ;;  %v1599_v35 = vpack.c.bf16 %v764_v27, %v762_v26  ;;  %v1601_v36 = vpack.c.bf16 %v769_v30, %v767_v29  ;;  %v786_v29 = vld [vmem:[#allocation14 + $0xc0] sm:$0xff]  ;;  %v788_v30 = vld [vmem:[#allocation14 + $0xd0] sm:$0xff] }
 0x111   :  { %1562 = vmatprep.subr.bf16.mxu1 %v1561_v40  ;;  %v773_v40 = vld [vmem:[#allocation14 + $0x58] sm:$0xff]  ;;  %v1623_v37 = vpack.c.bf16 %v788_v30, %v786_v29 }
 0x112   :  { %v825_v29 = vld [vmem:[#allocation14 + $0x1f8] sm:$0xff] }
 0x113   :  { %1532 = vmatpush3.bf16.msra.mxu0 %v1531_v46  ;;  %v641_v46 = vld [vmem:[#allocation11 + $0x18] sm:$0xff] }
 0x114   :  { %1564 = vmatpush3.bf16.msra.mxu1 %v1563_v47  ;;  %1534 = vmatprep.subr.bf16.mxu0 %v1533_v48  ;;  %v1605_v47 = vpack.c.bf16 %v773_v40, %v771_v39  ;;  %v770_v48 = vld [vmem:[#allocation14 + $0x40] sm:$0xff]  ;;  %v1577_v53 = vpack.c.bf16 %v641_v46, %v640_v43  ;;  %v792_v40 = vld [vmem:[#allocation14 + $0xf0] sm:$0xff] }
 0x115   :  { %1566 = vmatprep.subr.bf16.mxu1 %v1565_v49  ;;  %v772_v49 = vld [vmem:[#allocation14 + $0x50] sm:$0xff]  ;;  %v790_v39 = vld [vmem:[#allocation14 + $0xe0] sm:$0xff] }
 0x116   :  { %v1607_v56 = vpack.c.bf16 %v772_v49, %v770_v48  ;;  %v1627_v43 = vpack.c.bf16 %v792_v40, %v790_v39  ;;  %v796_v46 = vld [vmem:[#allocation14 + $0x110] sm:$0xff]  ;;  %v801_v48 = vld [vmem:[#allocation14 + $0x138] sm:$0xff] }
 0x117   :  { %1536 = vmatpush3.bf16.msra.mxu0 %v1535_v55  ;;  %v643_v55 = vld [vmem:[#allocation11 + $0x28] sm:$0xff] }
 0x118   :  { %1568 = vmatpush3.bf16.msra.mxu1 %v1567_v52  ;;  %1538 = vmatprep.subr.bf16.mxu0 %v1537_v62  ;;  %v777_v52 = vld [vmem:[#allocation14 + $0x78] sm:$0xff]  ;;  %v1580_v62 = vpack.c.bf16 %v643_v55, %v642_v54  ;;  %v803_v54 = vld [vmem:[#allocation14 + $0x148] sm:$0xff] }
 0x119   :  { %1570 = vmatprep.subr.bf16.mxu1 %v1569_v58  ;;  %v1609_v57 = vpack.c.bf16 %v777_v52, %v775_v51  ;;  %v774_v58 = vld [vmem:[#allocation14 + $0x60] sm:$0xff]  ;;  %v805_v55 = vld [vmem:[#allocation14 + $0x158] sm:$0xff] }
 0x11a   :  { %v1611_v2 = vpack.c.bf16 %v776_v59, %v774_v58  ;;  %v798_v52 = vld [vmem:[#allocation14 + $0x120] sm:$0xff]  ;;  %v804_v59 = vld [vmem:[#allocation14 + $0x150] sm:$0xff] }
 0x11b   :  { %1540 = vmatpush3.bf16.msra.mxu0 %v1539_v4  ;;  %v778_v4 = vld [vmem:[#allocation14 + $0x80] sm:$0xff] }
 0x11c   :  { %1572 = vmatpush3.bf16.msra.mxu1 %v1571_v3  ;;  %1573 = vmatprep.subr.bf16.mxu0 %v2140_v50  ;;  %v1613_v3 = vpack.c.bf16 %v781_v61, %v779_v60  ;;  %v802_v58 = vld [vmem:[#allocation14 + $0x140] sm:$0xff]  ;;  %v807_v60 = vld [vmem:[#allocation14 + $0x168] sm:$0xff]  ;;  %v809_v61 = vld [vmem:[#allocation14 + $0x178] sm:$0xff] }
 0x11d   :  { %1598 = vmatprep.subr.bf16.mxu1 %v1597_v7  ;;  %v785_v7 = vld [vmem:[#allocation14 + $0xb8] sm:$0xff]  ;;  %v1641_v63 = vpack.c.bf16 %v809_v61, %v807_v60  ;;  %v838_v60 = vld [vmem:[#allocation14 + $0x260] sm:$0xff]  ;;  %v840_v61 = vld [vmem:[#allocation14 + $0x270] sm:$0xff] }
 0x1d1   :  { %v346_v19 = vpop.f32.mrb[0].mxu0 }
 0x1d2   :  { %v2381_v20 = vadd.f32 %v346_v19, %v263_v15  ;;  %v417_v21 = vpop.f32.mrb[0].mxu1  ;;  %v348_v22 = vpop.f32.mrb[1].mxu0  ;;  %v1615_v15 = vpack.c.bf16 %v780_v5, %v778_v4  ;;  %v787_v19 = vld [vmem:[#allocation14 + $0xc8] sm:$0xff]  ;;  %v813_v4 = vld [vmem:[#allocation14 + $0x198] sm:$0xff] }
 0x1d3   :  { %v2383_v23 = vadd.f32 %v417_v21, %v271_v16  ;;  %v349_v24 = vadd.f32 %v348_v22, %v267_v17  ;;  %v419_v25 = vpop.f32.mrb[1].mxu1  ;;  %v1617_v16 = vpack.c.bf16 %v785_v7, %v783_v6  ;;  %v782_v17 = vld [vmem:[#allocation14 + $0xa0] sm:$0xff]  ;;  %v789_v21 = vld [vmem:[#allocation14 + $0xd8] sm:$0xff]  ;;  %v1586_v22 = vpack.c.bf16 %v647_v14, %v646_v12  ;;  %v815_v12 = vld [vmem:[#allocation14 + $0x1a8] sm:$0xff] }
 0x1d4   :  { %v2385_v28 = vadd.f32 %v419_v25, %v275_v18  ;;  %v422_v33 = vmax.f32 %v2381_v20, 0.0  ;;  %v784_v18 = vld [vmem:[#allocation14 + $0xb0] sm:$0xff]  ;;  %v1621_v27 = vpack.c.bf16 %v789_v21, %v787_v19  ;;  %v810_v7 = vld [vmem:[#allocation14 + $0x180] sm:$0xff]  ;;  %v817_v14 = vld [vmem:[#allocation14 + $0x1b8] sm:$0xff] }
 0x1d5   :  { %v424_v31 = vmax.f32 %v2383_v23, 0.0  ;;  %v423_v32 = vmax.f32 %v349_v24, 0.0  ;;  %v648_v24 = vld [vmem:[#allocation11 + $0x50] sm:$0xff]  ;;  %v649_v25 = vld [vmem:[#allocation11 + $0x58] sm:$0xff]  ;;  %v1619_v26 = vpack.c.bf16 %v784_v18, %v782_v17  ;;  %v814_v17 = vld [vmem:[#allocation14 + $0x1a0] sm:$0xff]  ;;  %v2417_v23 = vand.u32 127, %v260_v8 }
 0x1d6   :  { %v425_v34 = vmax.f32 %v2385_v28, 0.0  ;;  %v816_v18 = vld [vmem:[#allocation14 + $0x1b0] sm:$0xff]  ;;  %v819_v19 = vld [vmem:[#allocation14 + $0x1c8] sm:$0xff]  ;;  %v821_v21 = vld [vmem:[#allocation14 + $0x1d8] sm:$0xff] }
 0x1d7   :  { %561 = vmatprep.mubr.f32.mxu0 %v423_v32  ;;  %v845_v20 = vld [vmem:[#allocation14 + $0x298] sm:$0xff]  ;;  %vm734_vm1 = vcmp.ge.s32.totalorder %v2417_v23, 4  ;;  %vm735_vm2 = vcmp.lt.s32.totalorder %v2417_v23, 7  ;;  %vm733_vm4 = vcmp.lt.s32.totalorder %v2417_v23, 4 }
 0x1d8   :  { %631 = vmatprep.mubr.f32.mxu1 %v425_v34  ;;  %562 = vmatmul.mubr.f32.vlgmr.msra.gmra.mrb[2].mxu0 %v422_v33  ;;  %vm2421_vm3 = vmand %vm734_vm1, %vm735_vm2 }
 0x1d9   :  { %632 = vmatmul.mubr.f32.vlgmr.msra.gmra.mrb[2].mxu1 %v424_v31  ;;  %1575 = vmatpush3.bf16.msra.mxu0 %v1574_v45  ;;  %v794_v45 = vld [vmem:[#allocation14 + $0x100] sm:$0xff] }
 0x1da   :  { %1600 = vmatpush1.bf16.msra.mxu1 %v1599_v35  ;;  %954 = vmatprep.mubr.f32.mxu1 %v423_v32  ;;  %v791_v32 = vld [vmem:[#allocation14 + $0xe8] sm:$0xff]  ;;  %v793_v35 = vld [vmem:[#allocation14 + $0xf8] sm:$0xff]  ;;  %v1631_v49 = vpack.c.bf16 %v796_v46, %v794_v45 }
 0x1db   :  { %1602 = vmatprep.subr.bf16.mxu1 %v1601_v36  ;;  %1576 = vmatprep.subr.bf16.mxu0 %v2140_v50  ;;  %v1589_v36 = vpack.c.bf16 %v649_v25, %v648_v24  ;;  %v1625_v38 = vpack.c.bf16 %v793_v35, %v791_v32  ;;  %v1653_v24 = vpack.c.bf16 %v821_v21, %v819_v19  ;;  %v818_v25 = vld [vmem:[#allocation14 + $0x1c0] sm:$0xff] }
 0x1dc   :  { %v822_v35 = vld [vmem:[#allocation14 + $0x1e0] sm:$0xff]  ;;  %1442 = vmatprep.mubr.msk.f32.mxu0 %vm2141_vm0, %v2139_v0 }
 0x1dd   :  { %1578 = vmatpush3.bf16.msra.mxu0 %v1577_v53  ;;  %v800_v53 = vld [vmem:[#allocation14 + $0x130] sm:$0xff]  ;;  %v650_v19 = vld [vmem:[#allocation11 + $0x60] sm:$0xff]  ;;  %v651_v21 = vld [vmem:[#allocation11 + $0x68] sm:$0xff] }
 0x1de   :  { %1604 = vmatpush1.bf16.msra.mxu1 %v1603_v44  ;;  %1579 = vmatprep.subr.bf16.mxu0 %v2140_v50  ;;  %v1629_v44 = vpack.c.bf16 %v797_v42, %v795_v41  ;;  %v826_v41 = vld [vmem:[#allocation14 + $0x200] sm:$0xff]  ;;  %v828_v42 = vld [vmem:[#allocation14 + $0x210] sm:$0xff] }
 0x1df   :  { %1606 = vmatprep.subr.bf16.mxu1 %v1605_v47  ;;  %v799_v47 = vld [vmem:[#allocation14 + $0x128] sm:$0xff]  ;;  %v1663_v45 = vpack.c.bf16 %v828_v42, %v826_v41  ;;  %v865_v42 = vld [vmem:[#allocation14 + $0x338] sm:$0xff] }
 0x1e0   :  { %v1633_v51 = vpack.c.bf16 %v801_v48, %v799_v47  ;;  %v830_v47 = vld [vmem:[#allocation14 + $0x220] sm:$0xff]  ;;  %v832_v48 = vld [vmem:[#allocation14 + $0x230] sm:$0xff]  ;;  %v863_v41 = vld [vmem:[#allocation14 + $0x328] sm:$0xff] }
 0x1e1   :  { %1581 = vmatpush3.bf16.msra.mxu0 %v1580_v62  ;;  %v1639_v62 = vpack.c.bf16 %v804_v59, %v802_v58 }
 0x1e2   :  { %1608 = vmatpush1.bf16.msra.mxu1 %v1607_v56  ;;  %1582 = vmatprep.subr.bf16.mxu0 %v2140_v50  ;;  %v1635_v56 = vpack.c.bf16 %v800_v53, %v798_v52  ;;  %v1667_v52 = vpack.c.bf16 %v832_v48, %v830_v47  ;;  %v869_v47 = vld [vmem:[#allocation14 + $0x358] sm:$0xff] }
 0x1e3   :  { %1610 = vmatprep.subr.bf16.mxu1 %v1609_v57  ;;  %v1637_v57 = vpack.c.bf16 %v805_v55, %v803_v54  ;;  %v834_v54 = vld [vmem:[#allocation14 + $0x240] sm:$0xff]  ;;  %v836_v55 = vld [vmem:[#allocation14 + $0x250] sm:$0xff] }
 0x1e4   :  { %v1671_v58 = vpack.c.bf16 %v836_v55, %v834_v54  ;;  %v873_v54 = vld [vmem:[#allocation14 + $0x378] sm:$0xff] }
 0x1e5   :  { %1584 = vmatpush3.bf16.msra.mxu0 %v1583_v11  ;;  %v812_v11 = vld [vmem:[#allocation14 + $0x190] sm:$0xff] }
 0x1e6   :  { %1612 = vmatpush1.bf16.msra.mxu1 %v1611_v2  ;;  %1585 = vmatprep.subr.bf16.mxu0 %v2140_v50  ;;  %v808_v2 = vld [vmem:[#allocation14 + $0x170] sm:$0xff] }
 0x1e7   :  { %1614 = vmatprep.subr.bf16.mxu1 %v1613_v3  ;;  %v811_v3 = vld [vmem:[#allocation14 + $0x188] sm:$0xff]  ;;  %v1643_v5 = vpack.c.bf16 %v808_v2, %v806_v1  ;;  %v849_v2 = vld [vmem:[#allocation14 + $0x2b8] sm:$0xff] }
 0x1e8   :  { %v1645_v6 = vpack.c.bf16 %v813_v4, %v811_v3  ;;  %v847_v1 = vld [vmem:[#allocation14 + $0x2a8] sm:$0xff] }
 0x1e9   :  { %1587 = vmatpush3.bf16.msra.mxu0 %v1586_v22  ;;  %v1651_v22 = vpack.c.bf16 %v816_v18, %v814_v17  ;;  %v1681_v4 = vpack.c.bf16 %v849_v2, %v847_v1  ;;  %v855_v17 = vld [vmem:[#allocation14 + $0x2e8] sm:$0xff]  ;;  %v857_v18 = vld [vmem:[#allocation14 + $0x2f8] sm:$0xff]  ;;  %v878_v2 = vld [vmem:[#allocation14 + $0x3a0] sm:$0xff] }
 0x1ea   :  { %1616 = vmatpush1.bf16.msra.mxu1 %v1615_v15  ;;  %1588 = vmatprep.subr.bf16.mxu0 %v2140_v50  ;;  %v1647_v15 = vpack.c.bf16 %v812_v11, %v810_v7  ;;  %v851_v7 = vld [vmem:[#allocation14 + $0x2c8] sm:$0xff]  ;;  %v853_v11 = vld [vmem:[#allocation14 + $0x2d8] sm:$0xff] }
 0x1eb   :  { %1618 = vmatprep.subr.bf16.mxu1 %v1617_v16  ;;  %v1649_v16 = vpack.c.bf16 %v817_v14, %v815_v12  ;;  %v1685_v14 = vpack.c.bf16 %v853_v11, %v851_v7  ;;  %v882_v11 = vld [vmem:[#allocation14 + $0x3c0] sm:$0xff] }
 0x1ed   :  { %1590 = vmatpush3.bf16.msra.mxu0 %v1589_v36  ;;  %v824_v36 = vld [vmem:[#allocation14 + $0x1f0] sm:$0xff] }
 0x1ee   :  { %1620 = vmatpush1.bf16.msra.mxu1 %v1619_v26  ;;  %1591 = vmatprep.subr.bf16.mxu0 %v2140_v50  ;;  %v820_v26 = vld [vmem:[#allocation14 + $0x1d0] sm:$0xff]  ;;  %v1659_v39 = vpack.c.bf16 %v824_v36, %v822_v35 }
 0x1ef   :  { %1622 = vmatprep.subr.bf16.mxu1 %v1621_v27  ;;  %v823_v27 = vld [vmem:[#allocation14 + $0x1e8] sm:$0xff]  ;;  %v1655_v30 = vpack.c.bf16 %v820_v26, %v818_v25  ;;  %v1689_v25 = vpack.c.bf16 %v857_v18, %v855_v17  ;;  %v854_v26 = vld [vmem:[#allocation14 + $0x2e0] sm:$0xff]  ;;  %v653_v35 = vld [vmem:[#allocation11 + $0x78] sm:$0xff] }
 0x1f0   :  { %v1657_v32 = vpack.c.bf16 %v825_v29, %v823_v27  ;;  %v856_v27 = vld [vmem:[#allocation14 + $0x2f0] sm:$0xff]  ;;  %v859_v29 = vld [vmem:[#allocation14 + $0x308] sm:$0xff]  ;;  %v886_v18 = vld [vmem:[#allocation14 + $0x3e0] sm:$0xff] }
 0x1f1   :  { %v1691_v36 = vpack.c.bf16 %v856_v27, %v854_v26 }
 0x1f2   :  { %1624 = vmatpush1.bf16.msra.mxu1 %v1623_v37  ;;  %v827_v37 = vld [vmem:[#allocation14 + $0x208] sm:$0xff] }
 0x1f3   :  { %1626 = vmatprep.subr.bf16.mxu1 %v1625_v38  ;;  %v829_v38 = vld [vmem:[#allocation14 + $0x218] sm:$0xff] }
 0x1f4   :  { %v1661_v40 = vpack.c.bf16 %v829_v38, %v827_v37 }
 0x1f6   :  { %1628 = vmatpush1.bf16.msra.mxu1 %v1627_v43  ;;  %v831_v43 = vld [vmem:[#allocation14 + $0x228] sm:$0xff] }
 0x1f7   :  { %1630 = vmatprep.subr.bf16.mxu1 %v1629_v44  ;;  %v833_v44 = vld [vmem:[#allocation14 + $0x238] sm:$0xff] }
 0x1f8   :  { %v1665_v46 = vpack.c.bf16 %v833_v44, %v831_v43  ;;  %v1697_v44 = vpack.c.bf16 %v865_v42, %v863_v41 }
 0x1fa   :  { %1632 = vmatpush1.bf16.msra.mxu1 %v1631_v49  ;;  %v835_v49 = vld [vmem:[#allocation14 + $0x248] sm:$0xff] }
 0x1fb   :  { %1634 = vmatprep.subr.bf16.mxu1 %v1633_v51  ;;  %v837_v51 = vld [vmem:[#allocation14 + $0x258] sm:$0xff] }
 0x1fc   :  { %v1669_v53 = vpack.c.bf16 %v837_v51, %v835_v49  ;;  %v866_v51 = vld [vmem:[#allocation14 + $0x340] sm:$0xff] }
 0x1fe   :  { %1636 = vmatpush1.bf16.msra.mxu1 %v1635_v56  ;;  %v839_v56 = vld [vmem:[#allocation14 + $0x268] sm:$0xff] }
 0x1ff   :  { %1638 = vmatprep.subr.bf16.mxu1 %v1637_v57  ;;  %v841_v57 = vld [vmem:[#allocation14 + $0x278] sm:$0xff] }
 0x200   :  { %v1673_v59 = vpack.c.bf16 %v841_v57, %v839_v56  ;;  %v870_v57 = vld [vmem:[#allocation14 + $0x360] sm:$0xff] }
 0x202   :  { %1640 = vmatpush1.bf16.msra.mxu1 %v1639_v62  ;;  %v843_v62 = vld [vmem:[#allocation14 + $0x288] sm:$0xff] }
 0x203   :  { %1642 = vmatprep.subr.bf16.mxu1 %v1641_v63  ;;  %v1677_v28 = vpack.c.bf16 %v845_v20, %v843_v62  ;;  %v844_v63 = vld [vmem:[#allocation14 + $0x290] sm:$0xff]  ;;  %v874_v20 = vld [vmem:[#allocation14 + $0x380] sm:$0xff] }
 0x206   :  { %1644 = vmatpush1.bf16.msra.mxu1 %v1643_v5  ;;  %v846_v5 = vld [vmem:[#allocation14 + $0x2a0] sm:$0xff] }
 0x207   :  { %1646 = vmatprep.subr.bf16.mxu1 %v1645_v6  ;;  %v848_v6 = vld [vmem:[#allocation14 + $0x2b0] sm:$0xff] }
 0x208   :  { %v1683_v12 = vpack.c.bf16 %v848_v6, %v846_v5  ;;  %v885_v5 = vld [vmem:[#allocation14 + $0x3d8] sm:$0xff] }
 0x20a   :  { %1648 = vmatpush1.bf16.msra.mxu1 %v1647_v15  ;;  %v850_v15 = vld [vmem:[#allocation14 + $0x2c0] sm:$0xff] }
 0x20b   :  { %1650 = vmatprep.subr.bf16.mxu1 %v1649_v16  ;;  %v852_v16 = vld [vmem:[#allocation14 + $0x2d0] sm:$0xff] }
 0x20e   :  { %1652 = vmatpush1.bf16.msra.mxu1 %v1651_v22  ;;  %v1687_v22 = vpack.c.bf16 %v852_v16, %v850_v15  ;;  %v889_v15 = vld [vmem:[#allocation14 + $0x3f8] sm:$0xff] }
 0x20f   :  { %1654 = vmatprep.subr.bf16.mxu1 %v1653_v24  ;;  %v1592_v24 = vpack.c.bf16 %v651_v21, %v650_v19  ;;  %v888_v19 = vld [vmem:[#allocation14 + $0x3f0] sm:$0xff] }
 0x210   :  { %v1723_v21 = vpack.c.bf16 %v888_v19, %v886_v18  ;;  %v1050_v18 = vld [vmem:[#allocation17 + $0x90] sm:$0xff] }
 0x211   :  { %1593 = vmatpush3.bf16.msra.mxu0 %v1592_v24 }
 0x212   :  { %1656 = vmatpush1.bf16.msra.mxu1 %v1655_v30  ;;  %v861_v30 = vld [vmem:[#allocation14 + $0x318] sm:$0xff]  ;;  %1594 = vmatprep.subr.bf16.mxu0 %v2140_v50  ;;  %v862_v50 = vld [vmem:[#allocation14 + $0x320] sm:$0xff] }
 0x213   :  { %1658 = vmatprep.subr.bf16.mxu1 %v1657_v32  ;;  %v652_v32 = vld [vmem:[#allocation11 + $0x70] sm:$0xff]  ;;  %v1693_v38 = vpack.c.bf16 %v861_v30, %v859_v29 }
 0x214   :  { %v1595_v37 = vpack.c.bf16 %v653_v35, %v652_v32 }
 0x216   :  { %1660 = vmatpush1.bf16.msra.mxu1 %v1659_v39  ;;  %v858_v39 = vld [vmem:[#allocation14 + $0x300] sm:$0xff]  ;;  %1596 = vmatpush3.bf16.msra.mxu0 %v1595_v37 }
 0x217   :  { %1662 = vmatprep.subr.bf16.mxu1 %v1661_v40  ;;  %v860_v40 = vld [vmem:[#allocation14 + $0x310] sm:$0xff] }
 0x218   :  { %v1695_v43 = vpack.c.bf16 %v860_v40, %v858_v39  ;;  %v1176_v40 = vld [vmem:[#allocation19 + $0xb8] sm:$0xff] }
 0x219   :  { %955 = vmatmul.mubr.f32.vlgmr.msra.gmra.mrb[4].mxu1 %v422_v33  ;;  %v1675_v33 = vpack.c.bf16 %v840_v61, %v838_v60  ;;  %v877_v60 = vld [vmem:[#allocation14 + $0x398] sm:$0xff] }
 0x21a   :  { %1664 = vmatpush1.bf16.msra.mxu1 %v1663_v45  ;;  %1025 = vmatprep.mubr.f32.mxu1 %v425_v34  ;;  %v842_v34 = vld [vmem:[#allocation14 + $0x280] sm:$0xff]  ;;  %v864_v45 = vld [vmem:[#allocation14 + $0x330] sm:$0xff] }
 0x21b   :  { %1666 = vmatprep.subr.bf16.mxu1 %v1665_v46  ;;  %v1679_v3 = vpack.c.bf16 %v844_v63, %v842_v34  ;;  %v867_v46 = vld [vmem:[#allocation14 + $0x348] sm:$0xff]  ;;  %v1699_v48 = vpack.c.bf16 %v864_v45, %v862_v50  ;;  %v881_v34 = vld [vmem:[#allocation14 + $0x3b8] sm:$0xff] }
 0x21c   :  { %v1701_v49 = vpack.c.bf16 %v869_v47, %v867_v46  ;;  %v1032_v50 = vld [vmem:[#allocation17] sm:$0xff]  ;;  %v1034_v46 = vld [vmem:[#allocation17 + $0x10] sm:$0xff]  ;;  %v1037_v47 = vld [vmem:[#allocation17 + $0x28] sm:$0xff] }
 0x21e   :  { %1668 = vmatpush1.bf16.msra.mxu1 %v1667_v52  ;;  %v868_v52 = vld [vmem:[#allocation14 + $0x350] sm:$0xff] }
 0x21f   :  { %1670 = vmatprep.subr.bf16.mxu1 %v1669_v53  ;;  %v871_v53 = vld [vmem:[#allocation14 + $0x368] sm:$0xff]  ;;  %v1703_v55 = vpack.c.bf16 %v868_v52, %v866_v51 }
 0x220   :  { %v1705_v56 = vpack.c.bf16 %v873_v54, %v871_v53  ;;  %v1036_v52 = vld [vmem:[#allocation17 + $0x20] sm:$0xff]  ;;  %v1038_v53 = vld [vmem:[#allocation17 + $0x30] sm:$0xff]  ;;  %v1041_v54 = vld [vmem:[#allocation17 + $0x48] sm:$0xff] }
 0x222   :  { %1672 = vmatpush1.bf16.msra.mxu1 %v1671_v58  ;;  %v872_v58 = vld [vmem:[#allocation14 + $0x370] sm:$0xff] }
 0x223   :  { %1674 = vmatprep.subr.bf16.mxu1 %v1673_v59  ;;  %v875_v59 = vld [vmem:[#allocation14 + $0x388] sm:$0xff]  ;;  %v1707_v61 = vpack.c.bf16 %v872_v58, %v870_v57 }
 0x224   :  { %v1709_v62 = vpack.c.bf16 %v877_v60, %v875_v59  ;;  %v1040_v58 = vld [vmem:[#allocation17 + $0x40] sm:$0xff]  ;;  %v1042_v59 = vld [vmem:[#allocation17 + $0x50] sm:$0xff]  ;;  %v1045_v60 = vld [vmem:[#allocation17 + $0x68] sm:$0xff] }
 0x226   :  { %1676 = vmatpush1.bf16.msra.mxu1 %v1675_v33  ;;  %v876_v33 = vld [vmem:[#allocation14 + $0x390] sm:$0xff] }
 0x227   :  { %1678 = vmatprep.subr.bf16.mxu1 %v1677_v28  ;;  %v879_v28 = vld [vmem:[#allocation14 + $0x3a8] sm:$0xff]  ;;  %v1711_v63 = vpack.c.bf16 %v876_v33, %v874_v20 }
 0x228   :  { %v1713_v1 = vpack.c.bf16 %v881_v34, %v879_v28  ;;  %v1044_v33 = vld [vmem:[#allocation17 + $0x60] sm:$0xff]  ;;  %v1046_v28 = vld [vmem:[#allocation17 + $0x70] sm:$0xff] }
 0x229   :  { %v1739_v34 = vpack.c.bf16 %v1046_v28, %v1044_v33  ;;  %v1174_v33 = vld [vmem:[#allocation19 + $0xa8] sm:$0xff] }
 0x22a   :  { %1680 = vmatpush1.bf16.msra.mxu1 %v1679_v3  ;;  %v880_v3 = vld [vmem:[#allocation14 + $0x3b0] sm:$0xff] }
 0x22b   :  { %1682 = vmatprep.subr.bf16.mxu1 %v1681_v4  ;;  %v883_v4 = vld [vmem:[#allocation14 + $0x3c8] sm:$0xff]  ;;  %v1715_v6 = vpack.c.bf16 %v880_v3, %v878_v2 }
 0x22c   :  { %v1717_v7 = vpack.c.bf16 %v885_v5, %v883_v4 }
 0x22e   :  { %1684 = vmatpush1.bf16.msra.mxu1 %v1683_v12  ;;  %v884_v12 = vld [vmem:[#allocation14 + $0x3d0] sm:$0xff] }
 0x22f   :  { %1686 = vmatprep.subr.bf16.mxu1 %v1685_v14  ;;  %v887_v14 = vld [vmem:[#allocation14 + $0x3e8] sm:$0xff]  ;;  %v1719_v16 = vpack.c.bf16 %v884_v12, %v882_v11 }
 0x230   :  { %v1721_v17 = vpack.c.bf16 %v889_v15, %v887_v14  ;;  %v1049_v14 = vld [vmem:[#allocation17 + $0x88] sm:$0xff]  ;;  %v1051_v15 = vld [vmem:[#allocation17 + $0x98] sm:$0xff] }
 0x232   :  { %1688 = vmatpush1.bf16.msra.mxu1 %v1687_v22 }
 0x233   :  { %1690 = vmatprep.subr.bf16.mxu1 %v1689_v25  ;;  %v1285_v25 = vld [vmem:[#allocation10] ss:$0 sm:$0xff] }
 0x236   :  { %1692 = vmatpush1.bf16.msra.mxu1 %v1691_v36 }
 0x237   :  { %1694 = vmatprep.subr.bf16.mxu1 %v1693_v38 }
 0x23a   :  { %1696 = vmatpush1.bf16.msra.mxu1 %v1695_v43  ;;  %v1033_v43 = vld [vmem:[#allocation17 + $0x8] sm:$0xff] }
 0x23b   :  { %1698 = vmatprep.subr.bf16.mxu1 %v1697_v44  ;;  %v1035_v44 = vld [vmem:[#allocation17 + $0x18] sm:$0xff] }
 0x23c   :  { %v1725_v45 = vpack.c.bf16 %v1035_v44, %v1033_v43  ;;  %v1062_v43 = vld [vmem:[#allocation17 + $0xf0] sm:$0xff] }
 0x23e   :  { %1700 = vmatpush1.bf16.msra.mxu1 %v1699_v48  ;;  %v1039_v48 = vld [vmem:[#allocation17 + $0x38] sm:$0xff]  ;;  %1726 = vmatprep.subr.bf16.mxu0 %v1725_v45  ;;  %v1170_v45 = vld [vmem:[#allocation19 + $0x88] sm:$0xff] }
 0x23f   :  { %1702 = vmatprep.subr.bf16.mxu1 %v1701_v49  ;;  %v1727_v49 = vpack.c.bf16 %v1034_v46, %v1032_v50  ;;  %v1729_v51 = vpack.c.bf16 %v1039_v48, %v1037_v47  ;;  %v1169_v50 = vld [vmem:[#allocation19 + $0x80] sm:$0xff] }
 0x240   :  { %v1757_v46 = vpack.c.bf16 %v1170_v45, %v1169_v50 }
 0x242   :  { %1704 = vmatpush1.bf16.msra.mxu1 %v1703_v55  ;;  %v1043_v55 = vld [vmem:[#allocation17 + $0x58] sm:$0xff] }
 0x243   :  { %1706 = vmatprep.subr.bf16.mxu1 %v1705_v56  ;;  %v1731_v56 = vpack.c.bf16 %v1038_v53, %v1036_v52  ;;  %v1733_v57 = vpack.c.bf16 %v1043_v55, %v1041_v54  ;;  %v1154_v52 = vld [vmem:[#allocation19 + $0x8] sm:$0xff]  ;;  %v1171_v53 = vld [vmem:[#allocation19 + $0x90] sm:$0xff]  ;;  %v1172_v54 = vld [vmem:[#allocation19 + $0x98] sm:$0xff] }
 0x246   :  { %1708 = vmatpush1.bf16.msra.mxu1 %v1707_v61  ;;  %v1047_v61 = vld [vmem:[#allocation17 + $0x78] sm:$0xff] }
 0x247   :  { %1710 = vmatprep.subr.bf16.mxu1 %v1709_v62  ;;  %v1735_v62 = vpack.c.bf16 %v1042_v59, %v1040_v58  ;;  %v1737_v20 = vpack.c.bf16 %v1047_v61, %v1045_v60  ;;  %v1761_v60 = vpack.c.bf16 %v1172_v54, %v1171_v53  ;;  %v1155_v61 = vld [vmem:[#allocation19 + $0x10] sm:$0xff]  ;;  %v1287_v54 = vld [vmem:[#allocation20] ss:$0 sm:$0xff] }
 0x24a   :  { %1712 = vmatpush1.bf16.msra.mxu1 %v1711_v63 }
 0x24b   :  { %1714 = vmatprep.subr.bf16.mxu1 %v1713_v1 }
 0x24e   :  { %1716 = vmatpush1.bf16.msra.mxu1 %v1715_v6 }
 0x24f   :  { %1718 = vmatprep.subr.bf16.mxu1 %v1717_v7 }
 0x252   :  { %1720 = vmatpush1.bf16.msra.mxu1 %v1719_v16  ;;  %v1048_v16 = vld [vmem:[#allocation17 + $0x80] sm:$0xff] }
 0x253   :  { %1722 = vmatprep.subr.bf16.mxu1 %v1721_v17  ;;  %v1741_v17 = vpack.c.bf16 %v1051_v15, %v1049_v14  ;;  %v1743_v19 = vpack.c.bf16 %v1050_v18, %v1048_v16  ;;  %v1161_v14 = vld [vmem:[#allocation19 + $0x40] sm:$0xff]  ;;  %v1162_v15 = vld [vmem:[#allocation19 + $0x48] sm:$0xff]  ;;  %v1179_v16 = vld [vmem:[#allocation19 + $0xd0] sm:$0xff] }
 0x254   :  { %v1775_v18 = vpack.c.bf16 %v1162_v15, %v1161_v14 }
 0x256   :  { %1724 = vmatpush1.bf16.msra.mxu1 %v1723_v21  ;;  %v1053_v21 = vld [vmem:[#allocation17 + $0xa8] sm:$0xff] }
 0x259   :  { %1026 = vmatmul.mubr.f32.vlgmr.msra.gmra.mrb[4].mxu1 %v424_v31  ;;  %v1286_v31 = vld [vmem:[#allocation13] ss:$0 sm:$0xff] }
 0x2ab   :  { %v1320_v22 = vpop.f32.mrb[2].mxu0 }
 0x2ac   :  { %v1355_v24 = vpop.f32.mrb[2].mxu1  ;;  %v1321_v26 = vpop.f32.mrb[3].mxu0 }
 0x2ad   :  { %v1322_v27 = vadd.f32 %v1321_v26, %v1320_v22  ;;  %v1356_v29 = vpop.f32.mrb[3].mxu1  ;;  %v1055_v22 = vld [vmem:[#allocation17 + $0xb8] sm:$0xff]  ;;  %v1054_v26 = vld [vmem:[#allocation17 + $0xb0] sm:$0xff] }
 0x2ae   :  { %v1357_v30 = vadd.f32 %v1356_v29, %v1355_v24  ;;  %v1052_v24 = vld [vmem:[#allocation17 + $0xa0] sm:$0xff]  ;;  %v1059_v29 = vld [vmem:[#allocation17 + $0xd8] sm:$0xff] }
 0x2af   :  { %v564_v32 = vadd.f32 %v1322_v27, %v1285_v25  ;;  %v1745_v25 = vpack.c.bf16 %v1055_v22, %v1053_v21  ;;  %v1057_v27 = vld [vmem:[#allocation17 + $0xc8] sm:$0xff]  ;;  %v1163_v21 = vld [vmem:[#allocation19 + $0x50] sm:$0xff]  ;;  %v1164_v22 = vld [vmem:[#allocation19 + $0x58] sm:$0xff] }
 0x2b1   :  { %v634_v35 = vadd.f32 %v1357_v30, %v564_v32  ;;  %v1747_v30 = vpack.c.bf16 %v1054_v26, %v1052_v24  ;;  %v1749_v32 = vpack.c.bf16 %v1059_v29, %v1057_v27  ;;  %v1779_v24 = vpack.c.bf16 %v1164_v22, %v1163_v21  ;;  %v1182_v26 = vld [vmem:[#allocation19 + $0xe8] sm:$0xff]  ;;  %v1165_v29 = vld [vmem:[#allocation19 + $0x60] sm:$0xff] }
 0x2b3   :  { %v637_v36 = vmax.f32 %v634_v35, 0.0  ;;  %v1056_v35 = vld [vmem:[#allocation17 + $0xc0] sm:$0xff] }
 0x2b5   :  { %1443 = vmatmul.mubr.f32.vlgmr.msra.gmra.mrb[4].mxu0 %v637_v36  ;;  %v1058_v36 = vld [vmem:[#allocation17 + $0xd0] sm:$0xff] }
 0x2b6   :  { %1128 = vmatprep.mubr.f32.mxu0 %v2139_v0  ;;  %1728 = vmatpush1.bf16.msra.mxu0 %v1727_v49 }
 0x2b7   :  { %1730 = vmatprep.subr.bf16.mxu0 %v1729_v51  ;;  %v1153_v51 = vld [vmem:[#allocation19] sm:$0xff] }
 0x2b8   :  { %v1759_v58 = vpack.c.bf16 %v1154_v52, %v1153_v51 }
 0x2ba   :  { %1732 = vmatpush1.bf16.msra.mxu0 %v1731_v56 }
 0x2bb   :  { %1734 = vmatprep.subr.bf16.mxu0 %v1733_v57 }
 0x2be   :  { %1736 = vmatpush1.bf16.msra.mxu0 %v1735_v62  ;;  %v1156_v62 = vld [vmem:[#allocation19 + $0x18] sm:$0xff] }
 0x2bf   :  { %1738 = vmatprep.subr.bf16.mxu0 %v1737_v20  ;;  %v1173_v20 = vld [vmem:[#allocation19 + $0xa0] sm:$0xff]  ;;  %v1763_v28 = vpack.c.bf16 %v1156_v62, %v1155_v61 }
 0x2c2   :  { %1740 = vmatpush1.bf16.msra.mxu0 %v1739_v34  ;;  %v1765_v34 = vpack.c.bf16 %v1174_v33, %v1173_v20 }
 0x2c3   :  { %1742 = vmatprep.subr.bf16.mxu0 %v1741_v17  ;;  %v1180_v17 = vld [vmem:[#allocation19 + $0xd8] sm:$0xff] }
 0x2c6   :  { %1744 = vmatpush1.bf16.msra.mxu0 %v1743_v19  ;;  %v1777_v19 = vpack.c.bf16 %v1180_v17, %v1179_v16 }
 0x2c7   :  { %1746 = vmatprep.subr.bf16.mxu0 %v1745_v25  ;;  %v1181_v25 = vld [vmem:[#allocation19 + $0xe0] sm:$0xff] }
 0x2c8   :  { %v1781_v27 = vpack.c.bf16 %v1182_v26, %v1181_v25 }
 0x2ca   :  { %1748 = vmatpush1.bf16.msra.mxu0 %v1747_v30  ;;  %v1166_v30 = vld [vmem:[#allocation19 + $0x68] sm:$0xff] }
 0x2cb   :  { %1750 = vmatprep.subr.bf16.mxu0 %v1749_v32  ;;  %v1783_v32 = vpack.c.bf16 %v1166_v30, %v1165_v29 }
 0x32c   :  { %v2412_v37 = vpop.f32.mrb[4].mxu1 }
 0x32d   :  { %v2414_v38 = vpop.f32.mrb[5].mxu1 }
 0x388   :  { %v727_v39 = vpop.f32.mrb[4].mxu0 }
 0x389   :  { %v2425_v41 = vadd.f32 %v1286_v31, %v727_v39  ;;  %v1444_v0 = vpop.f32.mrb[5].mxu0  ;;  %v1061_v31 = vld [vmem:[#allocation17 + $0xe8] sm:$0xff]  ;;  %v1063_v39 = vld [vmem:[#allocation17 + $0xf8] sm:$0xff] }
 0x38a   :  { %v1751_v0 = vpack.c.bf16 %v1058_v36, %v1056_v35  ;;  %v1183_v35 = vld [vmem:[#allocation19 + $0xf0] sm:$0xff]  ;;  %v1184_v36 = vld [vmem:[#allocation19 + $0xf8] sm:$0xff] }
 0x38b   :  { %v740_v42 = vsel %vm2421_vm3, %v2425_v41, -1e+30  ;;  %v737_v8 = vsel %vm733_vm4, %v2425_v41, -1e+30 }
 0x38c   :  { %741 = vmax.xlane.f32.xlu0 %v740_v42  ;;  %v1753_v42 = vpack.c.bf16 %v1063_v39, %v1061_v31  ;;  %1752 = vmatpush1.bf16.msra.mxu0 %v1751_v0  ;;  %v1785_v31 = vpack.c.bf16 %v1184_v36, %v1183_v35  ;;  %v1167_v39 = vld [vmem:[#allocation19 + $0x70] sm:$0xff]  ;;  %v1168_v0 = vld [vmem:[#allocation19 + $0x78] sm:$0xff] }
 0x38e   :  { %1754 = vmatprep.subr.bf16.mxu0 %v1753_v42  ;;  %v1787_v42 = vpack.c.bf16 %v1168_v0, %v1167_v39 }
 0x390   :  { %738 = vmax.xlane.f32.xlu0 %v737_v8  ;;  %v1060_v8 = vld [vmem:[#allocation17 + $0xe0] sm:$0xff] }
 0x391   :  { %v1755_v44 = vpack.c.bf16 %v1062_v43, %v1060_v8  ;;  %v1137_v8 = vld [vmem:[#allocation16] sm:$0x3] }
 0x392   :  { %v1142_v43 = vrot.slane %v1137_v8, %v262_v10  ;;  %v1146_v50 = vrot.slane %v1137_v8, %v266_v13 }
 0x393   :  { %1756 = vmatpush1.bf16.msra.mxu0 %v1755_v44 }
 0x394   :  { %1758 = vmatprep.subr.bf16.mxu0 %v1757_v46 }
 0x419   :  { %v742_v63 = vpop.xlane.xlu0 %741 }
 0x41a   :  { %v744_v1 = vsub.f32 %v2425_v41, %v742_v63  ;;  %v1157_v63 = vld [vmem:[#allocation19 + $0x20] sm:$0xff] }
 0x41c   :  { %v745_v4 = vsel %vm2421_vm3, %v744_v1, -1e+30  ;;  %v1158_v1 = vld [vmem:[#allocation19 + $0x28] sm:$0xff] }
 0x41d   :  { %v739_v2 = vpop.xlane.xlu0 %738 }
 0x41e   :  { %v743_v3 = vsub.f32 %v2425_v41, %v739_v2  ;;  %v1175_v2 = vld [vmem:[#allocation19 + $0xb0] sm:$0xff] }
 0x41f   :  { %v1769_v23 = vpack.c.bf16 %v1176_v40, %v1175_v2 }
 0x420   :  { %v746_v5 = vsel %vm733_vm4, %v743_v3, %v745_v4  ;;  %v1767_v3 = vpack.c.bf16 %v1158_v1, %v1157_v63  ;;  %v1159_v4 = vld [vmem:[#allocation19 + $0x30] sm:$0xff] }
 0x421   :  { %v747_v6 = vmul.f32 1.442695, %v746_v5  ;;  %v1160_v5 = vld [vmem:[#allocation19 + $0x38] sm:$0xff] }
 0x423   :  { %1813 = vpow2.f32 %v747_v6  ;;  %v1177_v6 = vld [vmem:[#allocation19 + $0xc0] sm:$0xff] }
 0x42d   :  { %v1814_v7 = vpop.eup %1813 }
 0x42e   :  { %v752_v11 = vsel %vm2421_vm3, %v1814_v7, 0.0  ;;  %v749_v12 = vsel %vm733_vm4, %v1814_v7, 0.0 }
 0x42f   :  { %753 = vadd.xlane.f32.xlu1 %v752_v11  ;;  %v1771_v11 = vpack.c.bf16 %v1160_v5, %v1159_v4 }
 0x433   :  { %750 = vadd.xlane.f32.xlu1 %v749_v12 }
 0x4bc   :  { %v754_v47 = vpop.xlane.xlu1 %753 }
 0x4bd   :  { %1815 = vrcp.f32 %v754_v47 }
 0x4c0   :  { %v751_v48 = vpop.xlane.xlu1 %750 }
 0x4c1   :  { %1817 = vrcp.f32 %v751_v48 }
 0x4c7   :  { %v1816_v49 = vpop.eup %1815 }
 0x4c8   :  { %v759_v56 = vsel %vm2421_vm3, %v1816_v49, 0.0 }
 0x4cb   :  { %v1818_v55 = vpop.eup %1817 }
 0x4cc   :  { %v760_v57 = vsel %vm733_vm4, %v1818_v55, %v759_v56 }
 0x4cd   :  { %v761_v59 = vmul.f32 %v1814_v7, %v760_v57  ;;  %v1178_v7 = vld [vmem:[#allocation19 + $0xc8] sm:$0xff] }
 0x4ce   :  { %v1773_v12 = vpack.c.bf16 %v1178_v7, %v1177_v6 }
 0x4cf   :  { %1129 = vmatmul.mubr.f32.vlgmr.msra.gmra.mrb[6].mxu0 %v761_v59 }
 0x4d0   :  { %1760 = vmatpush3.bf16.msra.mxu0 %v1759_v58 }
 0x4d1   :  { %1762 = vmatprep.subr.bf16.mxu0 %v1761_v60 }
 0x4d4   :  { %1764 = vmatpush3.bf16.msra.mxu0 %v1763_v28 }
 0x4d5   :  { %1766 = vmatprep.subr.bf16.mxu0 %v1765_v34 }
 0x4d8   :  { %1768 = vmatpush3.bf16.msra.mxu0 %v1767_v3 }
 0x4d9   :  { %1770 = vmatprep.subr.bf16.mxu0 %v1769_v23 }
 0x4dc   :  { %1772 = vmatpush3.bf16.msra.mxu0 %v1771_v11 }
 0x4dd   :  { %1774 = vmatprep.subr.bf16.mxu0 %v1773_v12 }
 0x4e0   :  { %1776 = vmatpush3.bf16.msra.mxu0 %v1775_v18 }
 0x4e1   :  { %1778 = vmatprep.subr.bf16.mxu0 %v1777_v19 }
 0x4e4   :  { %1780 = vmatpush3.bf16.msra.mxu0 %v1779_v24 }
 0x4e5   :  { %1782 = vmatprep.subr.bf16.mxu0 %v1781_v27 }
 0x4e8   :  { %1784 = vmatpush3.bf16.msra.mxu0 %v1783_v32 }
 0x4e9   :  { %1786 = vmatprep.subr.bf16.mxu0 %v1785_v31 }
 0x4ec   :  { %1788 = vmatpush3.bf16.msra.mxu0 %v1787_v42 }
 0x5a2   :  { %v1130_v44 = vpop.f32.mrb[6].mxu0 }
 0x5a3   :  { %v1135_v45 = vmul.f32 %v1130_v44, %v2412_v37  ;;  %v1132_v46 = vpop.f32.mrb[7].mxu0 }
 0x5a4   :  { %v1136_v47 = vmul.f32 %v1132_v46, %v2414_v38 }
 0x5a5   :  { %v1149_v48 = vadd.f32 %v1142_v43, %v1135_v45 }
 0x5a6   :  { %v1150_v49 = vadd.f32 %v1146_v50, %v1136_v47 }
 0x5a7   :  { %v1151_v52 = vmax.f32 %v1149_v48, 0.0 }
 0x5a8   :  { %v1152_v51 = vmax.f32 %v1150_v49, 0.0 }
 0x5aa   :  { %1256 = vmatprep.mubr.f32.mxu0 %v1152_v51 }
 0x5ab   :  { %1257 = vmatmul.mubr.f32.vlgmr.msra.gmra.mrb[8].mxu0 %v1151_v52 }
 0x67e   :  { %v1407_v53 = vpop.f32.mrb[8].mxu0 }
 0x67f   :  { %v1408_v55 = vpop.f32.mrb[9].mxu0 }
 0x680   :  { %v1409_v56 = vadd.f32 %v1408_v55, %v1407_v53 }
 0x682   :  { %v1259_v10 = vadd.f32 %v1409_v56, %v1287_v54 }
 0x684   :  { %v1262_v9 = vadd.f32 %v1259_v10, %v2425_v41 }
 0x686   :  { %1263 = vst [vmem:[#allocation22] sm:$0xff] %v1262_v9 }
 0x687   :  { %2094 = shalt.err (!%p2091_p2)
}
 0x688   :  { %s2095_s26 = scalar_lea.hbm %s2479_s12, 128 }
 0x689   :  { %p2096_p3 = scmp.ne.s32.totalorder %s2479_s12, %s2095_s26  ;;  %p2099_p4 = scmp.lt.u32.totalorder %s2095_s26, %s2479_s12 }
 0x68b   :  { %p2101_p5 = pnand %p2099_p4, %p2096_p3 }
 0x68d   :  { %2104 = shalt.err (!%p2101_p5)
}
 0x68e   :  { %1273 = dma.vmem_to_hbm [thread:$0]  %s1271_s22, 128, %s2479_s12, [#allocation4]  }
 0x68f   :  { %2119 = dma.done.wait [#allocation4], 128  }
 0x690   :  { %2120 = vsyncadd [#allocation4], 4294967168 }
 0x691   :  { %1277 = vsyncpa [#allocation3], 1 }
 0x692   :  { %1278 = vsyncpa [#allocation6], 1 }
 0x693   :  { %1279 = vsyncpa [#allocation9], 1 }
 0x694   :  { %1280 = vsyncpa [#allocation12], 1 }
 0x695   :  { %1281 = vsyncpa [#allocation15], 1 }
 0x696   :  { %1282 = vsyncpa [#allocation18], 1 }
 0x697   :  { %1283 = vsyncpa [#allocation21], 1 }
 0x698   :  { %1284 = vsyncpa [#allocation4], 1 }

</bundles_post_ra>
